<compile_context>
chip_gen: v7x
topology: tpu7x:2x2x1
jax: 0.10.0
libtpu: 0.0.40
codegen_flags: <defaults>
</compile_context>

<pallas_src>
import jax
import jax.numpy as jnp
from jax import lax
from jax.experimental import pallas as pl
from jax.experimental.pallas import tpu as pltpu


def _const_spec(shape):
    n = len(shape)
    return pl.BlockSpec(shape, lambda t, _n=n: (0,) * _n)


# ----------------------------------------------------------------------------
# Fused Pallas kernel: whole T-step sequence through the L-layer ConvLSTM
# ----------------------------------------------------------------------------
def _make_seq_kernel(*, num_layers, W, KH, KW, chid, N):
    """In-kernel layout: channel-major (C, N), N = B*H*W on the lane axis,
    lane index n = b*H*W + y*W + x.

    refs: cx (layer-0 x-projection+bias, per-t block), consts, state_in,
          w_h0, w_1..w_{L-1}, y_out (per-t block), state_out, patch scratch.
    """
    L = num_layers
    n_taps = KH * KW
    cpt = 2 * chid                       # channels per tap, layers >= 1
    MASK0 = 0                            # consts row offsets (trace-time ints)
    PEEP0 = n_taps * cpt
    BIAS0 = PEEP0 + L * 3 * chid

    def gates(conv, peep_base, c_cur, consts_ref):
        wci = consts_ref[peep_base + 0 * chid:peep_base + 1 * chid, :]
        wcf = consts_ref[peep_base + 1 * chid:peep_base + 2 * chid, :]
        wco = consts_ref[peep_base + 2 * chid:peep_base + 3 * chid, :]
        # torch split order: (input_gate, forget_gate, tanh candidate, output gate)
        cc_i = conv[0 * chid:1 * chid]
        cc_f = conv[1 * chid:2 * chid]
        cc_g = conv[2 * chid:3 * chid]
        cc_o = conv[3 * chid:4 * chid]
        i_g = jax.nn.sigmoid(cc_i + wci * c_cur)
        f_g = jax.nn.sigmoid(cc_f + wcf * c_cur)
        g = jnp.tanh(cc_g)
        c_next = f_g * c_cur + i_g * g
        o_g = jax.nn.sigmoid(cc_o + wco * c_next)
        h_next = o_g * jnp.tanh(c_next)
        return h_next, c_next

    def build_patches(src, rows, consts_ref, patch_ref):
        # src: (rows, N).  One XLU lane-rotate + pre-broadcast mask per tap,
        # stored at an 8-aligned sublane offset (rows is a multiple of 8).
        for tap in range(n_taps):
            dy = tap // KW - KH // 2
            dx = tap % KW - KW // 2
            off = dy * W + dx
            if off == 0:
                shifted = src
            else:
                shifted = pltpu.roll(src, shift=(-off) % N, axis=1)
            m = consts_ref[MASK0 + tap * cpt:MASK0 + tap * cpt + rows, :]
            patch_ref[tap * rows:(tap + 1) * rows, :] = shifted * m

    def kernel(cx_ref, consts_ref, state_in_ref, *rest):
        w_refs = rest[:L]                      # [0]: (4c,25c), [l>=1]: (4c,25*2c)
        y_ref, state_ref = rest[L], rest[L + 1]
        patch_ref = rest[L + 2]

        t = pl.program_id(0)

        @pl.when(t == 0)
        def _():
            state_ref[...] = state_in_ref[...]  # state carried in this output block

        # ---- layer 0: x-projection precomputed; only h-projection in-loop --
        h0 = state_ref[0:chid, :]
        c0 = state_ref[chid:2 * chid, :]
        build_patches(h0, chid, consts_ref, patch_ref)
        conv0 = cx_ref[0] + jnp.dot(w_refs[0][...],
                                    patch_ref[0:n_taps * chid, :],
                                    preferred_element_type=jnp.float32)
        h_new, c_new = gates(conv0, PEEP0, c0, consts_ref)
        state_ref[0:chid, :] = h_new
        state_ref[chid:2 * chid, :] = c_new

        # ---- layers 1..L-1: fully recurrent, one K = 25*2*chid matmul ------
        for l in range(1, L):
            base = 2 * l * chid
            h_l = state_ref[base:base + chid, :]
            c_l = state_ref[base + chid:base + 2 * chid, :]
            xh = jnp.concatenate([h_new, h_l], axis=0)        # (2*chid, N)
            build_patches(xh, cpt, consts_ref, patch_ref)
            bias = consts_ref[BIAS0 + (l - 1) * 4 * chid:
                              BIAS0 + l * 4 * chid, :]
            conv = jnp.dot(w_refs[l][...], patch_ref[0:n_taps * cpt, :],
                           preferred_element_type=jnp.float32) + bias
            h_new, c_new = gates(conv, PEEP0 + l * 3 * chid, c_l, consts_ref)
            state_ref[base:base + chid, :] = h_new
            state_ref[base + chid:base + 2 * chid, :] = c_new

        y_ref[0] = h_new                      # (chid, 128): full-lane store

    return kernel


# ----------------------------------------------------------------------------
# predictor_lstm equivalent (stateful, L stacked peephole ConvLSTM cells)
# ----------------------------------------------------------------------------
class PredictorLSTMPallas:
    """Stateful JAX/Pallas port of the PyTorch `predictor_lstm` module."""

    def __init__(self, key, input_dim=(4, 8, 8), hidden_dim=8,
                 kernel_size=(5, 5), num_layers=2, batch_size=2):
        C, H, W = input_dim
        assert hidden_dim % 8 == 0, "hidden_dim must be a multiple of 8"
        assert num_layers >= 1
        self.num_layers = L = num_layers
        self.B, self.C, self.H, self.W = batch_size, C, H, W
        self.KH, self.KW = kernel_size
        self.chid = chid = hidden_dim
        self.N = N = batch_size * H * W
        assert N % 128 == 0, "B*H*W must be a multiple of 128 lanes"
        n_taps = self.KH * self.KW
        cpt = 2 * chid

        self.ref_params = []      # HWIO conv weights etc. (pure-JAX reference)
        self.w_refs = []          # kernel-layout (4*chid, K) weights
        peeps, biases_rest = [], []
        for i in range(L):
            cin = C if i == 0 else chid
            cc = cin + chid
            key, k1, k2, k3, k4, k5 = jax.random.split(key, 6)
            fan_in = cc * self.KH * self.KW
            scale = 1.0 / float(fan_in) ** 0.5
            w_hwio = jax.random.uniform(k1, (self.KH, self.KW, cc, 4 * chid),
                                        jnp.float32, -scale, scale)
            b = jax.random.uniform(k2, (4 * chid,), jnp.float32, -scale, scale)
            # torch initializes the peephole weights to zeros; small random
            # values are used so the peephole path is exercised by the check.
            wci = 0.1 * jax.random.normal(k3, (1, H, W, chid), jnp.float32)
            wcf = 0.1 * jax.random.normal(k4, (1, H, W, chid), jnp.float32)
            wco = 0.1 * jax.random.normal(k5, (1, H, W, chid), jnp.float32)
            self.ref_params.append((w_hwio, b, wci, wcf, wco))

            if i == 0:
                # split layer 0: x-projection precomputed outside the
                # recurrence; only the h-projection weights enter the kernel.
                self._w_x0 = w_hwio[:, :, :cin, :]            # (KH,KW,C,4chid)
                self._b0 = b
                w_mat = w_hwio[:, :, cin:, :].reshape(
                    n_taps * chid, 4 * chid).T
            else:
                w_mat = w_hwio.reshape(n_taps * cpt, 4 * chid).T
                biases_rest.append(jnp.broadcast_to(
                    b.reshape(4 * chid, 1), (4 * chid, N)).astype(jnp.float32))
            self.w_refs.append(jnp.asarray(w_mat, jnp.float32))
            peeps.append(jnp.concatenate(
                [self._peep_layout(p) for p in (wci, wcf, wco)], axis=0))

        # resident constants: [pre-broadcast boundary masks | packed peepholes
        # per layer | pre-broadcast biases for layers >= 1]
        mask = self._build_tap_mask()                         # (n_taps, N)
        mask_big = jnp.repeat(mask, cpt, axis=0)              # (n_taps*cpt, N)
        self.consts = jnp.concatenate([mask_big] + peeps + biases_rest, axis=0)

        # packed hidden/cell state in kernel layout: [h_0|c_0|h_1|c_1|...]
        self.state = jnp.zeros((2 * L * chid, N), jnp.float32)

        self._kernel = _make_seq_kernel(num_layers=L, W=W, KH=self.KH,
                                        KW=self.KW, chid=chid, N=N)
        self._step = jax.jit(self._run_seq)

    # --- layout helpers (done once at init, not per call) --------------------
    def _peep_layout(self, p):   # (1, H, W, chid) -> (chid, B*H*W)
        p = jnp.transpose(p[0], (2, 0, 1)).reshape(self.chid, self.H * self.W)
        return jnp.tile(p, (1, self.B))

    def _build_tap_mask(self):
        B, H, W, KH, KW = self.B, self.H, self.W, self.KH, self.KW
        n = jnp.arange(B * H * W)
        yy = (n % (H * W)) // W
        xx = n % W
        rows = []
        for t in range(KH * KW):
            dy = t // KW - KH // 2
            dx = t % KW - KW // 2
            ok = ((yy + dy >= 0) & (yy + dy < H) &
                  (xx + dx >= 0) & (xx + dx < W))
            rows.append(ok)
        return jnp.stack(rows).astype(jnp.float32)

    # --- one fused sequence (single pallas_call over all T frames) -----------
    def _run_seq(self, x_seq, state, consts, *w_list):
        T = x_seq.shape[0]
        B, C, H, W = self.B, self.C, self.H, self.W
        chid, N, L = self.chid, self.N, self.num_layers
        n_taps = self.KH * self.KW
        cpt = 2 * chid

        # layer-0 x-projection (+ bias) for the whole sequence: one batched
        # XLA conv outside the recurrence, reshaped to the kernel layout.
        x_nhwc = jnp.transpose(x_seq, (0, 1, 3, 4, 2)).reshape(T * B, H, W, C)
        cx = lax.conv_general_dilated(
            x_nhwc, self._w_x0, (1, 1), 'SAME',
            dimension_numbers=('NHWC', 'HWIO', 'NHWC'),
            precision=lax.Precision.HIGHEST) + self._b0.reshape(1, 1, 1, -1)
        cx = jnp.transpose(cx.reshape(T, B, H, W, 4 * chid),
                           (0, 4, 1, 2, 3)).reshape(T, 4 * chid, N)

        in_specs = ([pl.BlockSpec((1, 4 * chid, N), lambda t: (t, 0, 0)),
                     _const_spec(consts.shape),
                     _const_spec(state.shape)] +
                    [_const_spec(w.shape) for w in w_list])
        out_specs = (pl.BlockSpec((1, chid, N), lambda t: (t, 0, 0)),
                     _const_spec((2 * L * chid, N)))
        out_shape = (jax.ShapeDtypeStruct((T, chid, N), jnp.float32),
                     jax.ShapeDtypeStruct((2 * L * chid, N), jnp.float32))

        y_seq, new_state = pl.pallas_call(
            self._kernel,
            grid=(T,),
            out_shape=out_shape,
            in_specs=in_specs,
            out_specs=out_specs,
            scratch_shapes=[pltpu.VMEM((n_taps * cpt, N), jnp.float32)],
            compiler_params=pltpu.CompilerParams(
                dimension_semantics=("arbitrary",)),
        )(cx, consts, state, *w_list)

        # kernel layout -> (T, B, chid, H, W)
        y = jnp.transpose(y_seq.reshape(T, chid, B, H, W), (0, 2, 1, 3, 4))
        return y, new_state

    def __call__(self, x):
        """x: (B,C,H,W) single frame or (T,B,C,H,W) sequence (NCHW frames)."""
        single = (x.ndim == 4)
        x_seq = x[None] if single else x
        y, self.state = self._step(x_seq, self.state, self.consts,
                                   *self.w_refs)
        return y[0] if single else y


# ----------------------------------------------------------------------------
# Pure-JAX stateful reference (NHWC) mirroring the PyTorch module semantics
# ----------------------------------------------------------------------------
def _cell_ref(x, h, c, params):
    w_hwio, b, wci, wcf, wco = params
    xh = jnp.concatenate([x, h], axis=-1)
    conv = lax.conv_general_dilated(
        xh, w_hwio, window_strides=(1, 1), padding='SAME',
        dimension_numbers=('NHWC', 'HWIO', 'NHWC'),
        precision=lax.Precision.HIGHEST) + b.reshape(1, 1, 1, -1)
    cc_i, cc_f, cc_g, cc_o = jnp.split(conv, 4, axis=-1)
    i_g = jax.nn.sigmoid(cc_i + wci * c)
    f_g = jax.nn.sigmoid(cc_f + wcf * c)
    g = jnp.tanh(cc_g)
    c_next = f_g * c + i_g * g
    o_g = jax.nn.sigmoid(cc_o + wco * c_next)
    h_next = o_g * jnp.tanh(c_next)
    return h_next, c_next


class PredictorRef:
    def __init__(self, model):
        self.params = model.ref_params
        self.num_layers = model.num_layers
        B, H, W, chid = model.B, model.H, model.W, model.chid
        self.state = [(jnp.zeros((B, H, W, chid), jnp.float32),
                       jnp.zeros((B, H, W, chid), jnp.float32))
                      for _ in range(self.num_layers)]

    def __call__(self, x_nchw):
        h_in = jnp.transpose(x_nchw, (0, 2, 3, 1))
        for i in range(self.num_layers):
            h, c = _cell_ref(h_in, *self.state[i], self.params[i])
            self.state[i] = (h, c)
            h_in = h
        return jnp.transpose(h_in, (0, 3, 1, 2))


# ----------------------------------------------------------------------------
if __name__ == "__main__":
    key = jax.random.PRNGKey(0)
    key, kx, kp = jax.random.split(key, 3)

    B, C, H, W = 2, 4, 8, 8          # B*H*W = 128 -> exactly one lane per site
    hidden, T = 8, 4                 # T frames -> ONE pallas_call

    model = PredictorLSTMPallas(kp, input_dim=(C, H, W), hidden_dim=hidden,
                                kernel_size=(5, 5), num_layers=2,
                                batch_size=B)
    ref = PredictorRef(model)

    x_seq = jax.random.normal(kx, (T, B, C, H, W), jnp.float32)  # NCHW frames

    y_seq = jax.block_until_ready(model(x_seq))
    assert y_seq.shape == (T, B, hidden, H, W)

    # stateful reference, frame by frame (exercises non-zero h/c carry)
    max_err = 0.0
    for t in range(T):
        expected = jax.block_until_ready(ref(x_seq[t]))
        err = float(jnp.max(jnp.abs(y_seq[t] - expected)))
        max_err = max(max_err, err)
    assert max_err < 2e-3, f"max abs err {max_err}"

    print("KERNEL_OK")
</pallas_src>

<mosaic_0001>
module attributes {stable_mosaic.version = 11 : i64} {
  func.func @kernel(%arg0: i32, %arg1: memref<1x32x128xf32, #tpu.memory_space<vmem>>, %arg2: memref<480x128xf32, #tpu.memory_space<vmem>>, %arg3: memref<32x128xf32, #tpu.memory_space<vmem>>, %arg4: memref<32x200xf32, #tpu.memory_space<vmem>>, %arg5: memref<32x400xf32, #tpu.memory_space<vmem>>, %arg6: memref<1x8x128xf32, #tpu.memory_space<vmem>>, %arg7: memref<32x128xf32, #tpu.memory_space<vmem>>, %arg8: memref<400x128xf32, #tpu.memory_space<vmem>>) attributes {dimension_semantics = [#tpu.dimension_semantics<arbitrary>], iteration_bounds = array<i64: 4>, scalar_prefetch = 0 : i64, scratch_operands = 1 : i64, tpu.core_type = #tpu.core_type<tc>, window_params = [{transform_indices = @transform_0, window_bounds = array<i64: 1, 32, 128>}, {pipeline_mode = #tpu.pipeline_mode<synchronous>, transform_indices = @transform_1, window_bounds = array<i64: 480, 128>}, {pipeline_mode = #tpu.pipeline_mode<synchronous>, transform_indices = @transform_2, window_bounds = array<i64: 32, 128>}, {pipeline_mode = #tpu.pipeline_mode<synchronous>, transform_indices = @transform_3, window_bounds = array<i64: 32, 200>}, {pipeline_mode = #tpu.pipeline_mode<synchronous>, transform_indices = @transform_4, window_bounds = array<i64: 32, 400>}, {transform_indices = @transform_5, window_bounds = array<i64: 1, 8, 128>}, {pipeline_mode = #tpu.pipeline_mode<synchronous>, transform_indices = @transform_6, window_bounds = array<i64: 32, 128>}]} {
    %c0_i32 = arith.constant 0 : i32
    %0 = arith.cmpi eq, %arg0, %c0_i32 : i32
    %1 = arith.extui %0 : i1 to i32
    %c0_i32_0 = arith.constant 0 : i32
    %2 = arith.cmpi ne, %1, %c0_i32_0 : i32
    scf.if %2 {
      %c0_232 = arith.constant 0 : index
      %c0_233 = arith.constant 0 : index
      %292 = vector.load %arg3[%c0_232, %c0_233] : memref<32x128xf32, #tpu.memory_space<vmem>>, vector<32x128xf32>
      %c0_234 = arith.constant 0 : index
      %c0_235 = arith.constant 0 : index
      %293 = vector.load %arg7[%c0_234, %c0_235] : memref<32x128xf32, #tpu.memory_space<vmem>>, vector<32x128xf32>
      tpu.vector_store %arg7[%c0_234, %c0_235], %292 {strides = array<i32>} : memref<32x128xf32, #tpu.memory_space<vmem>>, vector<32x128xf32>,
    } else {
    }
    %c0 = arith.constant 0 : index
    %c0_1 = arith.constant 0 : index
    %3 = vector.load %arg7[%c0, %c0_1] : memref<32x128xf32, #tpu.memory_space<vmem>>, vector<8x128xf32>
    %c8 = arith.constant 8 : index
    %c0_2 = arith.constant 0 : index
    %4 = vector.load %arg7[%c8, %c0_2] : memref<32x128xf32, #tpu.memory_space<vmem>>, vector<8x128xf32>
    %c18_i32 = arith.constant 18 : i32
    %5 = tpu.dynamic_rotate %3 by %c18_i32 dim 1 : vector<8x128xf32>, i32 -> vector<8x128xf32>
    %c0_3 = arith.constant 0 : index
    %c0_4 = arith.constant 0 : index
    %6 = vector.load %arg2[%c0_3, %c0_4] : memref<480x128xf32, #tpu.memory_space<vmem>>, vector<8x128xf32>
    %7 = arith.mulf %5, %6 : vector<8x128xf32>
    %c0_5 = arith.constant 0 : index
    %c0_6 = arith.constant 0 : index
    %8 = vector.load %arg8[%c0_5, %c0_6] : memref<400x128xf32, #tpu.memory_space<vmem>>, vector<8x128xf32>
    tpu.vector_store %arg8[%c0_5, %c0_6], %7 {strides = array<i32>} : memref<400x128xf32, #tpu.memory_space<vmem>>, vector<8x128xf32>,
    %c17_i32 = arith.constant 17 : i32
    %9 = tpu.dynamic_rotate %3 by %c17_i32 dim 1 : vector<8x128xf32>, i32 -> vector<8x128xf32>
    %c16 = arith.constant 16 : index
    %c0_7 = arith.constant 0 : index
    %10 = vector.load %arg2[%c16, %c0_7] : memref<480x128xf32, #tpu.memory_space<vmem>>, vector<8x128xf32>
    %11 = arith.mulf %9, %10 : vector<8x128xf32>
    %c8_8 = arith.constant 8 : index
    %c0_9 = arith.constant 0 : index
    %12 = vector.load %arg8[%c8_8, %c0_9] : memref<400x128xf32, #tpu.memory_space<vmem>>, vector<8x128xf32>
    tpu.vector_store %arg8[%c8_8, %c0_9], %11 {strides = array<i32>} : memref<400x128xf32, #tpu.memory_space<vmem>>, vector<8x128xf32>,
    %c16_i32 = arith.constant 16 : i32
    %13 = tpu.dynamic_rotate %3 by %c16_i32 dim 1 : vector<8x128xf32>, i32 -> vector<8x128xf32>
    %c32 = arith.constant 32 : index
    %c0_10 = arith.constant 0 : index
    %14 = vector.load %arg2[%c32, %c0_10] : memref<480x128xf32, #tpu.memory_space<vmem>>, vector<8x128xf32>
    %15 = arith.mulf %13, %14 : vector<8x128xf32>
    %c16_11 = arith.constant 16 : index
    %c0_12 = arith.constant 0 : index
    %16 = vector.load %arg8[%c16_11, %c0_12] : memref<400x128xf32, #tpu.memory_space<vmem>>, vector<8x128xf32>
    tpu.vector_store %arg8[%c16_11, %c0_12], %15 {strides = array<i32>} : memref<400x128xf32, #tpu.memory_space<vmem>>, vector<8x128xf32>,
    %c15_i32 = arith.constant 15 : i32
    %17 = tpu.dynamic_rotate %3 by %c15_i32 dim 1 : vector<8x128xf32>, i32 -> vector<8x128xf32>
    %c48 = arith.constant 48 : index
    %c0_13 = arith.constant 0 : index
    %18 = vector.load %arg2[%c48, %c0_13] : memref<480x128xf32, #tpu.memory_space<vmem>>, vector<8x128xf32>
    %19 = arith.mulf %17, %18 : vector<8x128xf32>
    %c24 = arith.constant 24 : index
    %c0_14 = arith.constant 0 : index
    %20 = vector.load %arg8[%c24, %c0_14] : memref<400x128xf32, #tpu.memory_space<vmem>>, vector<8x128xf32>
    tpu.vector_store %arg8[%c24, %c0_14], %19 {strides = array<i32>} : memref<400x128xf32, #tpu.memory_space<vmem>>, vector<8x128xf32>,
    %c14_i32 = arith.constant 14 : i32
    %21 = tpu.dynamic_rotate %3 by %c14_i32 dim 1 : vector<8x128xf32>, i32 -> vector<8x128xf32>
    %c64 = arith.constant 64 : index
    %c0_15 = arith.constant 0 : index
    %22 = vector.load %arg2[%c64, %c0_15] : memref<480x128xf32, #tpu.memory_space<vmem>>, vector<8x128xf32>
    %23 = arith.mulf %21, %22 : vector<8x128xf32>
    %c32_16 = arith.constant 32 : index
    %c0_17 = arith.constant 0 : index
    %24 = vector.load %arg8[%c32_16, %c0_17] : memref<400x128xf32, #tpu.memory_space<vmem>>, vector<8x128xf32>
    tpu.vector_store %arg8[%c32_16, %c0_17], %23 {strides = array<i32>} : memref<400x128xf32, #tpu.memory_space<vmem>>, vector<8x128xf32>,
    %c10_i32 = arith.constant 10 : i32
    %25 = tpu.dynamic_rotate %3 by %c10_i32 dim 1 : vector<8x128xf32>, i32 -> vector<8x128xf32>
    %c80 = arith.constant 80 : index
    %c0_18 = arith.constant 0 : index
    %26 = vector.load %arg2[%c80, %c0_18] : memref<480x128xf32, #tpu.memory_space<vmem>>, vector<8x128xf32>
    %27 = arith.mulf %25, %26 : vector<8x128xf32>
    %c40 = arith.constant 40 : index
    %c0_19 = arith.constant 0 : index
    %28 = vector.load %arg8[%c40, %c0_19] : memref<400x128xf32, #tpu.memory_space<vmem>>, vector<8x128xf32>
    tpu.vector_store %arg8[%c40, %c0_19], %27 {strides = array<i32>} : memref<400x128xf32, #tpu.memory_space<vmem>>, vector<8x128xf32>,
    %c9_i32 = arith.constant 9 : i32
    %29 = tpu.dynamic_rotate %3 by %c9_i32 dim 1 : vector<8x128xf32>, i32 -> vector<8x128xf32>
    %c96 = arith.constant 96 : index
    %c0_20 = arith.constant 0 : index
    %30 = vector.load %arg2[%c96, %c0_20] : memref<480x128xf32, #tpu.memory_space<vmem>>, vector<8x128xf32>
    %31 = arith.mulf %29, %30 : vector<8x128xf32>
    %c48_21 = arith.constant 48 : index
    %c0_22 = arith.constant 0 : index
    %32 = vector.load %arg8[%c48_21, %c0_22] : memref<400x128xf32, #tpu.memory_space<vmem>>, vector<8x128xf32>
    tpu.vector_store %arg8[%c48_21, %c0_22], %31 {strides = array<i32>} : memref<400x128xf32, #tpu.memory_space<vmem>>, vector<8x128xf32>,
    %c8_i32 = arith.constant 8 : i32
    %33 = tpu.dynamic_rotate %3 by %c8_i32 dim 1 : vector<8x128xf32>, i32 -> vector<8x128xf32>
    %c112 = arith.constant 112 : index
    %c0_23 = arith.constant 0 : index
    %34 = vector.load %arg2[%c112, %c0_23] : memref<480x128xf32, #tpu.memory_space<vmem>>, vector<8x128xf32>
    %35 = arith.mulf %33, %34 : vector<8x128xf32>
    %c56 = arith.constant 56 : index
    %c0_24 = arith.constant 0 : index
    %36 = vector.load %arg8[%c56, %c0_24] : memref<400x128xf32, #tpu.memory_space<vmem>>, vector<8x128xf32>
    tpu.vector_store %arg8[%c56, %c0_24], %35 {strides = array<i32>} : memref<400x128xf32, #tpu.memory_space<vmem>>, vector<8x128xf32>,
    %c7_i32 = arith.constant 7 : i32
    %37 = tpu.dynamic_rotate %3 by %c7_i32 dim 1 : vector<8x128xf32>, i32 -> vector<8x128xf32>
    %c128 = arith.constant 128 : index
    %c0_25 = arith.constant 0 : index
    %38 = vector.load %arg2[%c128, %c0_25] : memref<480x128xf32, #tpu.memory_space<vmem>>, vector<8x128xf32>
    %39 = arith.mulf %37, %38 : vector<8x128xf32>
    %c64_26 = arith.constant 64 : index
    %c0_27 = arith.constant 0 : index
    %40 = vector.load %arg8[%c64_26, %c0_27] : memref<400x128xf32, #tpu.memory_space<vmem>>, vector<8x128xf32>
    tpu.vector_store %arg8[%c64_26, %c0_27], %39 {strides = array<i32>} : memref<400x128xf32, #tpu.memory_space<vmem>>, vector<8x128xf32>,
    %c6_i32 = arith.constant 6 : i32
    %41 = tpu.dynamic_rotate %3 by %c6_i32 dim 1 : vector<8x128xf32>, i32 -> vector<8x128xf32>
    %c144 = arith.constant 144 : index
    %c0_28 = arith.constant 0 : index
    %42 = vector.load %arg2[%c144, %c0_28] : memref<480x128xf32, #tpu.memory_space<vmem>>, vector<8x128xf32>
    %43 = arith.mulf %41, %42 : vector<8x128xf32>
    %c72 = arith.constant 72 : index
    %c0_29 = arith.constant 0 : index
    %44 = vector.load %arg8[%c72, %c0_29] : memref<400x128xf32, #tpu.memory_space<vmem>>, vector<8x128xf32>
    tpu.vector_store %arg8[%c72, %c0_29], %43 {strides = array<i32>} : memref<400x128xf32, #tpu.memory_space<vmem>>, vector<8x128xf32>,
    %c2_i32 = arith.constant 2 : i32
    %45 = tpu.dynamic_rotate %3 by %c2_i32 dim 1 : vector<8x128xf32>, i32 -> vector<8x128xf32>
    %c160 = arith.constant 160 : index
    %c0_30 = arith.constant 0 : index
    %46 = vector.load %arg2[%c160, %c0_30] : memref<480x128xf32, #tpu.memory_space<vmem>>, vector<8x128xf32>
    %47 = arith.mulf %45, %46 : vector<8x128xf32>
    %c80_31 = arith.constant 80 : index
    %c0_32 = arith.constant 0 : index
    %48 = vector.load %arg8[%c80_31, %c0_32] : memref<400x128xf32, #tpu.memory_space<vmem>>, vector<8x128xf32>
    tpu.vector_store %arg8[%c80_31, %c0_32], %47 {strides = array<i32>} : memref<400x128xf32, #tpu.memory_space<vmem>>, vector<8x128xf32>,
    %c1_i32 = arith.constant 1 : i32
    %49 = tpu.dynamic_rotate %3 by %c1_i32 dim 1 : vector<8x128xf32>, i32 -> vector<8x128xf32>
    %c176 = arith.constant 176 : index
    %c0_33 = arith.constant 0 : index
    %50 = vector.load %arg2[%c176, %c0_33] : memref<480x128xf32, #tpu.memory_space<vmem>>, vector<8x128xf32>
    %51 = arith.mulf %49, %50 : vector<8x128xf32>
    %c88 = arith.constant 88 : index
    %c0_34 = arith.constant 0 : index
    %52 = vector.load %arg8[%c88, %c0_34] : memref<400x128xf32, #tpu.memory_space<vmem>>, vector<8x128xf32>
    tpu.vector_store %arg8[%c88, %c0_34], %51 {strides = array<i32>} : memref<400x128xf32, #tpu.memory_space<vmem>>, vector<8x128xf32>,
    %c192 = arith.constant 192 : index
    %c0_35 = arith.constant 0 : index
    %53 = vector.load %arg2[%c192, %c0_35] : memref<480x128xf32, #tpu.memory_space<vmem>>, vector<8x128xf32>
    %54 = arith.mulf %3, %53 : vector<8x128xf32>
    %c96_36 = arith.constant 96 : index
    %c0_37 = arith.constant 0 : index
    %55 = vector.load %arg8[%c96_36, %c0_37] : memref<400x128xf32, #tpu.memory_space<vmem>>, vector<8x128xf32>
    tpu.vector_store %arg8[%c96_36, %c0_37], %54 {strides = array<i32>} : memref<400x128xf32, #tpu.memory_space<vmem>>, vector<8x128xf32>,
    %c127_i32 = arith.constant 127 : i32
    %56 = tpu.dynamic_rotate %3 by %c127_i32 dim 1 : vector<8x128xf32>, i32 -> vector<8x128xf32>
    %c208 = arith.constant 208 : index
    %c0_38 = arith.constant 0 : index
    %57 = vector.load %arg2[%c208, %c0_38] : memref<480x128xf32, #tpu.memory_space<vmem>>, vector<8x128xf32>
    %58 = arith.mulf %56, %57 : vector<8x128xf32>
    %c104 = arith.constant 104 : index
    %c0_39 = arith.constant 0 : index
    %59 = vector.load %arg8[%c104, %c0_39] : memref<400x128xf32, #tpu.memory_space<vmem>>, vector<8x128xf32>
    tpu.vector_store %arg8[%c104, %c0_39], %58 {strides = array<i32>} : memref<400x128xf32, #tpu.memory_space<vmem>>, vector<8x128xf32>,
    %c126_i32 = arith.constant 126 : i32
    %60 = tpu.dynamic_rotate %3 by %c126_i32 dim 1 : vector<8x128xf32>, i32 -> vector<8x128xf32>
    %c224 = arith.constant 224 : index
    %c0_40 = arith.constant 0 : index
    %61 = vector.load %arg2[%c224, %c0_40] : memref<480x128xf32, #tpu.memory_space<vmem>>, vector<8x128xf32>
    %62 = arith.mulf %60, %61 : vector<8x128xf32>
    %c112_41 = arith.constant 112 : index
    %c0_42 = arith.constant 0 : index
    %63 = vector.load %arg8[%c112_41, %c0_42] : memref<400x128xf32, #tpu.memory_space<vmem>>, vector<8x128xf32>
    tpu.vector_store %arg8[%c112_41, %c0_42], %62 {strides = array<i32>} : memref<400x128xf32, #tpu.memory_space<vmem>>, vector<8x128xf32>,
    %c122_i32 = arith.constant 122 : i32
    %64 = tpu.dynamic_rotate %3 by %c122_i32 dim 1 : vector<8x128xf32>, i32 -> vector<8x128xf32>
    %c240 = arith.constant 240 : index
    %c0_43 = arith.constant 0 : index
    %65 = vector.load %arg2[%c240, %c0_43] : memref<480x128xf32, #tpu.memory_space<vmem>>, vector<8x128xf32>
    %66 = arith.mulf %64, %65 : vector<8x128xf32>
    %c120 = arith.constant 120 : index
    %c0_44 = arith.constant 0 : index
    %67 = vector.load %arg8[%c120, %c0_44] : memref<400x128xf32, #tpu.memory_space<vmem>>, vector<8x128xf32>
    tpu.vector_store %arg8[%c120, %c0_44], %66 {strides = array<i32>} : memref<400x128xf32, #tpu.memory_space<vmem>>, vector<8x128xf32>,
    %c121_i32 = arith.constant 121 : i32
    %68 = tpu.dynamic_rotate %3 by %c121_i32 dim 1 : vector<8x128xf32>, i32 -> vector<8x128xf32>
    %c256 = arith.constant 256 : index
    %c0_45 = arith.constant 0 : index
    %69 = vector.load %arg2[%c256, %c0_45] : memref<480x128xf32, #tpu.memory_space<vmem>>, vector<8x128xf32>
    %70 = arith.mulf %68, %69 : vector<8x128xf32>
    %c128_46 = arith.constant 128 : index
    %c0_47 = arith.constant 0 : index
    %71 = vector.load %arg8[%c128_46, %c0_47] : memref<400x128xf32, #tpu.memory_space<vmem>>, vector<8x128xf32>
    tpu.vector_store %arg8[%c128_46, %c0_47], %70 {strides = array<i32>} : memref<400x128xf32, #tpu.memory_space<vmem>>, vector<8x128xf32>,
    %c120_i32 = arith.constant 120 : i32
    %72 = tpu.dynamic_rotate %3 by %c120_i32 dim 1 : vector<8x128xf32>, i32 -> vector<8x128xf32>
    %c272 = arith.constant 272 : index
    %c0_48 = arith.constant 0 : index
    %73 = vector.load %arg2[%c272, %c0_48] : memref<480x128xf32, #tpu.memory_space<vmem>>, vector<8x128xf32>
    %74 = arith.mulf %72, %73 : vector<8x128xf32>
    %c136 = arith.constant 136 : index
    %c0_49 = arith.constant 0 : index
    %75 = vector.load %arg8[%c136, %c0_49] : memref<400x128xf32, #tpu.memory_space<vmem>>, vector<8x128xf32>
    tpu.vector_store %arg8[%c136, %c0_49], %74 {strides = array<i32>} : memref<400x128xf32, #tpu.memory_space<vmem>>, vector<8x128xf32>,
    %c119_i32 = arith.constant 119 : i32
    %76 = tpu.dynamic_rotate %3 by %c119_i32 dim 1 : vector<8x128xf32>, i32 -> vector<8x128xf32>
    %c288 = arith.constant 288 : index
    %c0_50 = arith.constant 0 : index
    %77 = vector.load %arg2[%c288, %c0_50] : memref<480x128xf32, #tpu.memory_space<vmem>>, vector<8x128xf32>
    %78 = arith.mulf %76, %77 : vector<8x128xf32>
    %c144_51 = arith.constant 144 : index
    %c0_52 = arith.constant 0 : index
    %79 = vector.load %arg8[%c144_51, %c0_52] : memref<400x128xf32, #tpu.memory_space<vmem>>, vector<8x128xf32>
    tpu.vector_store %arg8[%c144_51, %c0_52], %78 {strides = array<i32>} : memref<400x128xf32, #tpu.memory_space<vmem>>, vector<8x128xf32>,
    %c118_i32 = arith.constant 118 : i32
    %80 = tpu.dynamic_rotate %3 by %c118_i32 dim 1 : vector<8x128xf32>, i32 -> vector<8x128xf32>
    %c304 = arith.constant 304 : index
    %c0_53 = arith.constant 0 : index
    %81 = vector.load %arg2[%c304, %c0_53] : memref<480x128xf32, #tpu.memory_space<vmem>>, vector<8x128xf32>
    %82 = arith.mulf %80, %81 : vector<8x128xf32>
    %c152 = arith.constant 152 : index
    %c0_54 = arith.constant 0 : index
    %83 = vector.load %arg8[%c152, %c0_54] : memref<400x128xf32, #tpu.memory_space<vmem>>, vector<8x128xf32>
    tpu.vector_store %arg8[%c152, %c0_54], %82 {strides = array<i32>} : memref<400x128xf32, #tpu.memory_space<vmem>>, vector<8x128xf32>,
    %c114_i32 = arith.constant 114 : i32
    %84 = tpu.dynamic_rotate %3 by %c114_i32 dim 1 : vector<8x128xf32>, i32 -> vector<8x128xf32>
    %c320 = arith.constant 320 : index
    %c0_55 = arith.constant 0 : index
    %85 = vector.load %arg2[%c320, %c0_55] : memref<480x128xf32, #tpu.memory_space<vmem>>, vector<8x128xf32>
    %86 = arith.mulf %84, %85 : vector<8x128xf32>
    %c160_56 = arith.constant 160 : index
    %c0_57 = arith.constant 0 : index
    %87 = vector.load %arg8[%c160_56, %c0_57] : memref<400x128xf32, #tpu.memory_space<vmem>>, vector<8x128xf32>
    tpu.vector_store %arg8[%c160_56, %c0_57], %86 {strides = array<i32>} : memref<400x128xf32, #tpu.memory_space<vmem>>, vector<8x128xf32>,
    %c113_i32 = arith.constant 113 : i32
    %88 = tpu.dynamic_rotate %3 by %c113_i32 dim 1 : vector<8x128xf32>, i32 -> vector<8x128xf32>
    %c336 = arith.constant 336 : index
    %c0_58 = arith.constant 0 : index
    %89 = vector.load %arg2[%c336, %c0_58] : memref<480x128xf32, #tpu.memory_space<vmem>>, vector<8x128xf32>
    %90 = arith.mulf %88, %89 : vector<8x128xf32>
    %c168 = arith.constant 168 : index
    %c0_59 = arith.constant 0 : index
    %91 = vector.load %arg8[%c168, %c0_59] : memref<400x128xf32, #tpu.memory_space<vmem>>, vector<8x128xf32>
    tpu.vector_store %arg8[%c168, %c0_59], %90 {strides = array<i32>} : memref<400x128xf32, #tpu.memory_space<vmem>>, vector<8x128xf32>,
    %c112_i32 = arith.constant 112 : i32
    %92 = tpu.dynamic_rotate %3 by %c112_i32 dim 1 : vector<8x128xf32>, i32 -> vector<8x128xf32>
    %c352 = arith.constant 352 : index
    %c0_60 = arith.constant 0 : index
    %93 = vector.load %arg2[%c352, %c0_60] : memref<480x128xf32, #tpu.memory_space<vmem>>, vector<8x128xf32>
    %94 = arith.mulf %92, %93 : vector<8x128xf32>
    %c176_61 = arith.constant 176 : index
    %c0_62 = arith.constant 0 : index
    %95 = vector.load %arg8[%c176_61, %c0_62] : memref<400x128xf32, #tpu.memory_space<vmem>>, vector<8x128xf32>
    tpu.vector_store %arg8[%c176_61, %c0_62], %94 {strides = array<i32>} : memref<400x128xf32, #tpu.memory_space<vmem>>, vector<8x128xf32>,
    %c111_i32 = arith.constant 111 : i32
    %96 = tpu.dynamic_rotate %3 by %c111_i32 dim 1 : vector<8x128xf32>, i32 -> vector<8x128xf32>
    %c368 = arith.constant 368 : index
    %c0_63 = arith.constant 0 : index
    %97 = vector.load %arg2[%c368, %c0_63] : memref<480x128xf32, #tpu.memory_space<vmem>>, vector<8x128xf32>
    %98 = arith.mulf %96, %97 : vector<8x128xf32>
    %c184 = arith.constant 184 : index
    %c0_64 = arith.constant 0 : index
    %99 = vector.load %arg8[%c184, %c0_64] : memref<400x128xf32, #tpu.memory_space<vmem>>, vector<8x128xf32>
    tpu.vector_store %arg8[%c184, %c0_64], %98 {strides = array<i32>} : memref<400x128xf32, #tpu.memory_space<vmem>>, vector<8x128xf32>,
    %c110_i32 = arith.constant 110 : i32
    %100 = tpu.dynamic_rotate %3 by %c110_i32 dim 1 : vector<8x128xf32>, i32 -> vector<8x128xf32>
    %c384 = arith.constant 384 : index
    %c0_65 = arith.constant 0 : index
    %101 = vector.load %arg2[%c384, %c0_65] : memref<480x128xf32, #tpu.memory_space<vmem>>, vector<8x128xf32>
    %102 = arith.mulf %100, %101 : vector<8x128xf32>
    %c192_66 = arith.constant 192 : index
    %c0_67 = arith.constant 0 : index
    %103 = vector.load %arg8[%c192_66, %c0_67] : memref<400x128xf32, #tpu.memory_space<vmem>>, vector<8x128xf32>
    tpu.vector_store %arg8[%c192_66, %c0_67], %102 {strides = array<i32>} : memref<400x128xf32, #tpu.memory_space<vmem>>, vector<8x128xf32>,
    %c0_68 = arith.constant 0 : index
    %c0_69 = arith.constant 0 : index
    %c0_70 = arith.constant 0 : index
    %104 = vector.load %arg1[%c0_68, %c0_69, %c0_70] : memref<1x32x128xf32, #tpu.memory_space<vmem>>, vector<1x32x128xf32>
    %105 = vector.shape_cast %104 : vector<1x32x128xf32> to vector<32x128xf32>
    %c0_71 = arith.constant 0 : index
    %c0_72 = arith.constant 0 : index
    %106 = vector.load %arg4[%c0_71, %c0_72] : memref<32x200xf32, #tpu.memory_space<vmem>>, vector<32x200xf32>
    %c0_73 = arith.constant 0 : index
    %c0_74 = arith.constant 0 : index
    %107 = vector.load %arg8[%c0_73, %c0_74] : memref<400x128xf32, #tpu.memory_space<vmem>>, vector<200x128xf32>
    %cst = arith.constant dense<0.000000e+00> : vector<32x128xf32>
    %108 = tpu.matmul %106, %107, %cst {dimension_numbers = #tpu.dot_dimension_numbers<[1], [0], [0], [1], [0, 0, 1, 1], [], []>} : vector<32x200xf32>, vector<200x128xf32>, vector<32x128xf32> -> vector<32x128xf32>
    %109 = arith.addf %105, %108 : vector<32x128xf32>
    %c400 = arith.constant 400 : index
    %c0_75 = arith.constant 0 : index
    %110 = vector.load %arg2[%c400, %c0_75] : memref<480x128xf32, #tpu.memory_space<vmem>>, vector<8x128xf32>
    %c408 = arith.constant 408 : index
    %c0_76 = arith.constant 0 : index
    %111 = vector.load %arg2[%c408, %c0_76] : memref<480x128xf32, #tpu.memory_space<vmem>>, vector<8x128xf32>
    %c416 = arith.constant 416 : index
    %c0_77 = arith.constant 0 : index
    %112 = vector.load %arg2[%c416, %c0_77] : memref<480x128xf32, #tpu.memory_space<vmem>>, vector<8x128xf32>
    %113 = vector.extract_strided_slice %109 {offsets = [0, 0], sizes = [8, 128], strides = [1, 1]} : vector<32x128xf32> to vector<8x128xf32>
    %114 = vector.extract_strided_slice %109 {offsets = [8, 0], sizes = [8, 128], strides = [1, 1]} : vector<32x128xf32> to vector<8x128xf32>
    %115 = vector.extract_strided_slice %109 {offsets = [16, 0], sizes = [8, 128], strides = [1, 1]} : vector<32x128xf32> to vector<8x128xf32>
    %116 = vector.extract_strided_slice %109 {offsets = [24, 0], sizes = [8, 128], strides = [1, 1]} : vector<32x128xf32> to vector<8x128xf32>
    %117 = arith.mulf %110, %4 : vector<8x128xf32>
    %118 = arith.addf %113, %117 : vector<8x128xf32>
    %119 = arith.negf %118 : vector<8x128xf32>
    %120 = math.exp %119 : vector<8x128xf32>
    %cst_78 = arith.constant 1.000000e+00 : f32
    %121 = vector.broadcast %cst_78 : f32 to vector<8x128xf32>
    %122 = arith.addf %121, %120 : vector<8x128xf32>
    %123 = arith.divf %121, %122 : vector<8x128xf32>
    %124 = arith.mulf %111, %4 : vector<8x128xf32>
    %125 = arith.addf %114, %124 : vector<8x128xf32>
    %126 = arith.negf %125 : vector<8x128xf32>
    %127 = math.exp %126 : vector<8x128xf32>
    %cst_79 = arith.constant 1.000000e+00 : f32
    %128 = vector.broadcast %cst_79 : f32 to vector<8x128xf32>
    %129 = arith.addf %128, %127 : vector<8x128xf32>
    %130 = arith.divf %128, %129 : vector<8x128xf32>
    %131 = math.tanh %115 : vector<8x128xf32>
    %132 = arith.mulf %130, %4 : vector<8x128xf32>
    %133 = arith.mulf %123, %131 : vector<8x128xf32>
    %134 = arith.addf %132, %133 : vector<8x128xf32>
    %135 = arith.mulf %112, %134 : vector<8x128xf32>
    %136 = arith.addf %116, %135 : vector<8x128xf32>
    %137 = arith.negf %136 : vector<8x128xf32>
    %138 = math.exp %137 : vector<8x128xf32>
    %cst_80 = arith.constant 1.000000e+00 : f32
    %139 = vector.broadcast %cst_80 : f32 to vector<8x128xf32>
    %140 = arith.addf %139, %138 : vector<8x128xf32>
    %141 = arith.divf %139, %140 : vector<8x128xf32>
    %142 = math.tanh %134 : vector<8x128xf32>
    %143 = arith.mulf %141, %142 : vector<8x128xf32>
    %c0_81 = arith.constant 0 : index
    %c0_82 = arith.constant 0 : index
    %144 = vector.load %arg7[%c0_81, %c0_82] : memref<32x128xf32, #tpu.memory_space<vmem>>, vector<8x128xf32>
    tpu.vector_store %arg7[%c0_81, %c0_82], %143 {strides = array<i32>} : memref<32x128xf32, #tpu.memory_space<vmem>>, vector<8x128xf32>,
    %c8_83 = arith.constant 8 : index
    %c0_84 = arith.constant 0 : index
    %145 = vector.load %arg7[%c8_83, %c0_84] : memref<32x128xf32, #tpu.memory_space<vmem>>, vector<8x128xf32>
    tpu.vector_store %arg7[%c8_83, %c0_84], %134 {strides = array<i32>} : memref<32x128xf32, #tpu.memory_space<vmem>>, vector<8x128xf32>,
    %c16_85 = arith.constant 16 : index
    %c0_86 = arith.constant 0 : index
    %146 = vector.load %arg7[%c16_85, %c0_86] : memref<32x128xf32, #tpu.memory_space<vmem>>, vector<8x128xf32>
    %c24_87 = arith.constant 24 : index
    %c0_88 = arith.constant 0 : index
    %147 = vector.load %arg7[%c24_87, %c0_88] : memref<32x128xf32, #tpu.memory_space<vmem>>, vector<8x128xf32>
    %148 = tpu.concatenate %143, %146 in 0 : vector<8x128xf32>, vector<8x128xf32> -> vector<16x128xf32>
    %c18_i32_89 = arith.constant 18 : i32
    %149 = tpu.dynamic_rotate %148 by %c18_i32_89 dim 1 : vector<16x128xf32>, i32 -> vector<16x128xf32>
    %c0_90 = arith.constant 0 : index
    %c0_91 = arith.constant 0 : index
    %150 = vector.load %arg2[%c0_90, %c0_91] : memref<480x128xf32, #tpu.memory_space<vmem>>, vector<16x128xf32>
    %151 = arith.mulf %149, %150 : vector<16x128xf32>
    %c0_92 = arith.constant 0 : index
    %c0_93 = arith.constant 0 : index
    %152 = vector.load %arg8[%c0_92, %c0_93] : memref<400x128xf32, #tpu.memory_space<vmem>>, vector<16x128xf32>
    tpu.vector_store %arg8[%c0_92, %c0_93], %151 {strides = array<i32>} : memref<400x128xf32, #tpu.memory_space<vmem>>, vector<16x128xf32>,
    %c17_i32_94 = arith.constant 17 : i32
    %153 = tpu.dynamic_rotate %148 by %c17_i32_94 dim 1 : vector<16x128xf32>, i32 -> vector<16x128xf32>
    %c16_95 = arith.constant 16 : index
    %c0_96 = arith.constant 0 : index
    %154 = vector.load %arg2[%c16_95, %c0_96] : memref<480x128xf32, #tpu.memory_space<vmem>>, vector<16x128xf32>
    %155 = arith.mulf %153, %154 : vector<16x128xf32>
    %c16_97 = arith.constant 16 : index
    %c0_98 = arith.constant 0 : index
    %156 = vector.load %arg8[%c16_97, %c0_98] : memref<400x128xf32, #tpu.memory_space<vmem>>, vector<16x128xf32>
    tpu.vector_store %arg8[%c16_97, %c0_98], %155 {strides = array<i32>} : memref<400x128xf32, #tpu.memory_space<vmem>>, vector<16x128xf32>,
    %c16_i32_99 = arith.constant 16 : i32
    %157 = tpu.dynamic_rotate %148 by %c16_i32_99 dim 1 : vector<16x128xf32>, i32 -> vector<16x128xf32>
    %c32_100 = arith.constant 32 : index
    %c0_101 = arith.constant 0 : index
    %158 = vector.load %arg2[%c32_100, %c0_101] : memref<480x128xf32, #tpu.memory_space<vmem>>, vector<16x128xf32>
    %159 = arith.mulf %157, %158 : vector<16x128xf32>
    %c32_102 = arith.constant 32 : index
    %c0_103 = arith.constant 0 : index
    %160 = vector.load %arg8[%c32_102, %c0_103] : memref<400x128xf32, #tpu.memory_space<vmem>>, vector<16x128xf32>
    tpu.vector_store %arg8[%c32_102, %c0_103], %159 {strides = array<i32>} : memref<400x128xf32, #tpu.memory_space<vmem>>, vector<16x128xf32>,
    %c15_i32_104 = arith.constant 15 : i32
    %161 = tpu.dynamic_rotate %148 by %c15_i32_104 dim 1 : vector<16x128xf32>, i32 -> vector<16x128xf32>
    %c48_105 = arith.constant 48 : index
    %c0_106 = arith.constant 0 : index
    %162 = vector.load %arg2[%c48_105, %c0_106] : memref<480x128xf32, #tpu.memory_space<vmem>>, vector<16x128xf32>
    %163 = arith.mulf %161, %162 : vector<16x128xf32>
    %c48_107 = arith.constant 48 : index
    %c0_108 = arith.constant 0 : index
    %164 = vector.load %arg8[%c48_107, %c0_108] : memref<400x128xf32, #tpu.memory_space<vmem>>, vector<16x128xf32>
    tpu.vector_store %arg8[%c48_107, %c0_108], %163 {strides = array<i32>} : memref<400x128xf32, #tpu.memory_space<vmem>>, vector<16x128xf32>,
    %c14_i32_109 = arith.constant 14 : i32
    %165 = tpu.dynamic_rotate %148 by %c14_i32_109 dim 1 : vector<16x128xf32>, i32 -> vector<16x128xf32>
    %c64_110 = arith.constant 64 : index
    %c0_111 = arith.constant 0 : index
    %166 = vector.load %arg2[%c64_110, %c0_111] : memref<480x128xf32, #tpu.memory_space<vmem>>, vector<16x128xf32>
    %167 = arith.mulf %165, %166 : vector<16x128xf32>
    %c64_112 = arith.constant 64 : index
    %c0_113 = arith.constant 0 : index
    %168 = vector.load %arg8[%c64_112, %c0_113] : memref<400x128xf32, #tpu.memory_space<vmem>>, vector<16x128xf32>
    tpu.vector_store %arg8[%c64_112, %c0_113], %167 {strides = array<i32>} : memref<400x128xf32, #tpu.memory_space<vmem>>, vector<16x128xf32>,
    %c10_i32_114 = arith.constant 10 : i32
    %169 = tpu.dynamic_rotate %148 by %c10_i32_114 dim 1 : vector<16x128xf32>, i32 -> vector<16x128xf32>
    %c80_115 = arith.constant 80 : index
    %c0_116 = arith.constant 0 : index
    %170 = vector.load %arg2[%c80_115, %c0_116] : memref<480x128xf32, #tpu.memory_space<vmem>>, vector<16x128xf32>
    %171 = arith.mulf %169, %170 : vector<16x128xf32>
    %c80_117 = arith.constant 80 : index
    %c0_118 = arith.constant 0 : index
    %172 = vector.load %arg8[%c80_117, %c0_118] : memref<400x128xf32, #tpu.memory_space<vmem>>, vector<16x128xf32>
    tpu.vector_store %arg8[%c80_117, %c0_118], %171 {strides = array<i32>} : memref<400x128xf32, #tpu.memory_space<vmem>>, vector<16x128xf32>,
    %c9_i32_119 = arith.constant 9 : i32
    %173 = tpu.dynamic_rotate %148 by %c9_i32_119 dim 1 : vector<16x128xf32>, i32 -> vector<16x128xf32>
    %c96_120 = arith.constant 96 : index
    %c0_121 = arith.constant 0 : index
    %174 = vector.load %arg2[%c96_120, %c0_121] : memref<480x128xf32, #tpu.memory_space<vmem>>, vector<16x128xf32>
    %175 = arith.mulf %173, %174 : vector<16x128xf32>
    %c96_122 = arith.constant 96 : index
    %c0_123 = arith.constant 0 : index
    %176 = vector.load %arg8[%c96_122, %c0_123] : memref<400x128xf32, #tpu.memory_space<vmem>>, vector<16x128xf32>
    tpu.vector_store %arg8[%c96_122, %c0_123], %175 {strides = array<i32>} : memref<400x128xf32, #tpu.memory_space<vmem>>, vector<16x128xf32>,
    %c8_i32_124 = arith.constant 8 : i32
    %177 = tpu.dynamic_rotate %148 by %c8_i32_124 dim 1 : vector<16x128xf32>, i32 -> vector<16x128xf32>
    %c112_125 = arith.constant 112 : index
    %c0_126 = arith.constant 0 : index
    %178 = vector.load %arg2[%c112_125, %c0_126] : memref<480x128xf32, #tpu.memory_space<vmem>>, vector<16x128xf32>
    %179 = arith.mulf %177, %178 : vector<16x128xf32>
    %c112_127 = arith.constant 112 : index
    %c0_128 = arith.constant 0 : index
    %180 = vector.load %arg8[%c112_127, %c0_128] : memref<400x128xf32, #tpu.memory_space<vmem>>, vector<16x128xf32>
    tpu.vector_store %arg8[%c112_127, %c0_128], %179 {strides = array<i32>} : memref<400x128xf32, #tpu.memory_space<vmem>>, vector<16x128xf32>,
    %c7_i32_129 = arith.constant 7 : i32
    %181 = tpu.dynamic_rotate %148 by %c7_i32_129 dim 1 : vector<16x128xf32>, i32 -> vector<16x128xf32>
    %c128_130 = arith.constant 128 : index
    %c0_131 = arith.constant 0 : index
    %182 = vector.load %arg2[%c128_130, %c0_131] : memref<480x128xf32, #tpu.memory_space<vmem>>, vector<16x128xf32>
    %183 = arith.mulf %181, %182 : vector<16x128xf32>
    %c128_132 = arith.constant 128 : index
    %c0_133 = arith.constant 0 : index
    %184 = vector.load %arg8[%c128_132, %c0_133] : memref<400x128xf32, #tpu.memory_space<vmem>>, vector<16x128xf32>
    tpu.vector_store %arg8[%c128_132, %c0_133], %183 {strides = array<i32>} : memref<400x128xf32, #tpu.memory_space<vmem>>, vector<16x128xf32>,
    %c6_i32_134 = arith.constant 6 : i32
    %185 = tpu.dynamic_rotate %148 by %c6_i32_134 dim 1 : vector<16x128xf32>, i32 -> vector<16x128xf32>
    %c144_135 = arith.constant 144 : index
    %c0_136 = arith.constant 0 : index
    %186 = vector.load %arg2[%c144_135, %c0_136] : memref<480x128xf32, #tpu.memory_space<vmem>>, vector<16x128xf32>
    %187 = arith.mulf %185, %186 : vector<16x128xf32>
    %c144_137 = arith.constant 144 : index
    %c0_138 = arith.constant 0 : index
    %188 = vector.load %arg8[%c144_137, %c0_138] : memref<400x128xf32, #tpu.memory_space<vmem>>, vector<16x128xf32>
    tpu.vector_store %arg8[%c144_137, %c0_138], %187 {strides = array<i32>} : memref<400x128xf32, #tpu.memory_space<vmem>>, vector<16x128xf32>,
    %c2_i32_139 = arith.constant 2 : i32
    %189 = tpu.dynamic_rotate %148 by %c2_i32_139 dim 1 : vector<16x128xf32>, i32 -> vector<16x128xf32>
    %c160_140 = arith.constant 160 : index
    %c0_141 = arith.constant 0 : index
    %190 = vector.load %arg2[%c160_140, %c0_141] : memref<480x128xf32, #tpu.memory_space<vmem>>, vector<16x128xf32>
    %191 = arith.mulf %189, %190 : vector<16x128xf32>
    %c160_142 = arith.constant 160 : index
    %c0_143 = arith.constant 0 : index
    %192 = vector.load %arg8[%c160_142, %c0_143] : memref<400x128xf32, #tpu.memory_space<vmem>>, vector<16x128xf32>
    tpu.vector_store %arg8[%c160_142, %c0_143], %191 {strides = array<i32>} : memref<400x128xf32, #tpu.memory_space<vmem>>, vector<16x128xf32>,
    %c1_i32_144 = arith.constant 1 : i32
    %193 = tpu.dynamic_rotate %148 by %c1_i32_144 dim 1 : vector<16x128xf32>, i32 -> vector<16x128xf32>
    %c176_145 = arith.constant 176 : index
    %c0_146 = arith.constant 0 : index
    %194 = vector.load %arg2[%c176_145, %c0_146] : memref<480x128xf32, #tpu.memory_space<vmem>>, vector<16x128xf32>
    %195 = arith.mulf %193, %194 : vector<16x128xf32>
    %c176_147 = arith.constant 176 : index
    %c0_148 = arith.constant 0 : index
    %196 = vector.load %arg8[%c176_147, %c0_148] : memref<400x128xf32, #tpu.memory_space<vmem>>, vector<16x128xf32>
    tpu.vector_store %arg8[%c176_147, %c0_148], %195 {strides = array<i32>} : memref<400x128xf32, #tpu.memory_space<vmem>>, vector<16x128xf32>,
    %c192_149 = arith.constant 192 : index
    %c0_150 = arith.constant 0 : index
    %197 = vector.load %arg2[%c192_149, %c0_150] : memref<480x128xf32, #tpu.memory_space<vmem>>, vector<16x128xf32>
    %198 = arith.mulf %148, %197 : vector<16x128xf32>
    %c192_151 = arith.constant 192 : index
    %c0_152 = arith.constant 0 : index
    %199 = vector.load %arg8[%c192_151, %c0_152] : memref<400x128xf32, #tpu.memory_space<vmem>>, vector<16x128xf32>
    tpu.vector_store %arg8[%c192_151, %c0_152], %198 {strides = array<i32>} : memref<400x128xf32, #tpu.memory_space<vmem>>, vector<16x128xf32>,
    %c127_i32_153 = arith.constant 127 : i32
    %200 = tpu.dynamic_rotate %148 by %c127_i32_153 dim 1 : vector<16x128xf32>, i32 -> vector<16x128xf32>
    %c208_154 = arith.constant 208 : index
    %c0_155 = arith.constant 0 : index
    %201 = vector.load %arg2[%c208_154, %c0_155] : memref<480x128xf32, #tpu.memory_space<vmem>>, vector<16x128xf32>
    %202 = arith.mulf %200, %201 : vector<16x128xf32>
    %c208_156 = arith.constant 208 : index
    %c0_157 = arith.constant 0 : index
    %203 = vector.load %arg8[%c208_156, %c0_157] : memref<400x128xf32, #tpu.memory_space<vmem>>, vector<16x128xf32>
    tpu.vector_store %arg8[%c208_156, %c0_157], %202 {strides = array<i32>} : memref<400x128xf32, #tpu.memory_space<vmem>>, vector<16x128xf32>,
    %c126_i32_158 = arith.constant 126 : i32
    %204 = tpu.dynamic_rotate %148 by %c126_i32_158 dim 1 : vector<16x128xf32>, i32 -> vector<16x128xf32>
    %c224_159 = arith.constant 224 : index
    %c0_160 = arith.constant 0 : index
    %205 = vector.load %arg2[%c224_159, %c0_160] : memref<480x128xf32, #tpu.memory_space<vmem>>, vector<16x128xf32>
    %206 = arith.mulf %204, %205 : vector<16x128xf32>
    %c224_161 = arith.constant 224 : index
    %c0_162 = arith.constant 0 : index
    %207 = vector.load %arg8[%c224_161, %c0_162] : memref<400x128xf32, #tpu.memory_space<vmem>>, vector<16x128xf32>
    tpu.vector_store %arg8[%c224_161, %c0_162], %206 {strides = array<i32>} : memref<400x128xf32, #tpu.memory_space<vmem>>, vector<16x128xf32>,
    %c122_i32_163 = arith.constant 122 : i32
    %208 = tpu.dynamic_rotate %148 by %c122_i32_163 dim 1 : vector<16x128xf32>, i32 -> vector<16x128xf32>
    %c240_164 = arith.constant 240 : index
    %c0_165 = arith.constant 0 : index
    %209 = vector.load %arg2[%c240_164, %c0_165] : memref<480x128xf32, #tpu.memory_space<vmem>>, vector<16x128xf32>
    %210 = arith.mulf %208, %209 : vector<16x128xf32>
    %c240_166 = arith.constant 240 : index
    %c0_167 = arith.constant 0 : index
    %211 = vector.load %arg8[%c240_166, %c0_167] : memref<400x128xf32, #tpu.memory_space<vmem>>, vector<16x128xf32>
    tpu.vector_store %arg8[%c240_166, %c0_167], %210 {strides = array<i32>} : memref<400x128xf32, #tpu.memory_space<vmem>>, vector<16x128xf32>,
    %c121_i32_168 = arith.constant 121 : i32
    %212 = tpu.dynamic_rotate %148 by %c121_i32_168 dim 1 : vector<16x128xf32>, i32 -> vector<16x128xf32>
    %c256_169 = arith.constant 256 : index
    %c0_170 = arith.constant 0 : index
    %213 = vector.load %arg2[%c256_169, %c0_170] : memref<480x128xf32, #tpu.memory_space<vmem>>, vector<16x128xf32>
    %214 = arith.mulf %212, %213 : vector<16x128xf32>
    %c256_171 = arith.constant 256 : index
    %c0_172 = arith.constant 0 : index
    %215 = vector.load %arg8[%c256_171, %c0_172] : memref<400x128xf32, #tpu.memory_space<vmem>>, vector<16x128xf32>
    tpu.vector_store %arg8[%c256_171, %c0_172], %214 {strides = array<i32>} : memref<400x128xf32, #tpu.memory_space<vmem>>, vector<16x128xf32>,
    %c120_i32_173 = arith.constant 120 : i32
    %216 = tpu.dynamic_rotate %148 by %c120_i32_173 dim 1 : vector<16x128xf32>, i32 -> vector<16x128xf32>
    %c272_174 = arith.constant 272 : index
    %c0_175 = arith.constant 0 : index
    %217 = vector.load %arg2[%c272_174, %c0_175] : memref<480x128xf32, #tpu.memory_space<vmem>>, vector<16x128xf32>
    %218 = arith.mulf %216, %217 : vector<16x128xf32>
    %c272_176 = arith.constant 272 : index
    %c0_177 = arith.constant 0 : index
    %219 = vector.load %arg8[%c272_176, %c0_177] : memref<400x128xf32, #tpu.memory_space<vmem>>, vector<16x128xf32>
    tpu.vector_store %arg8[%c272_176, %c0_177], %218 {strides = array<i32>} : memref<400x128xf32, #tpu.memory_space<vmem>>, vector<16x128xf32>,
    %c119_i32_178 = arith.constant 119 : i32
    %220 = tpu.dynamic_rotate %148 by %c119_i32_178 dim 1 : vector<16x128xf32>, i32 -> vector<16x128xf32>
    %c288_179 = arith.constant 288 : index
    %c0_180 = arith.constant 0 : index
    %221 = vector.load %arg2[%c288_179, %c0_180] : memref<480x128xf32, #tpu.memory_space<vmem>>, vector<16x128xf32>
    %222 = arith.mulf %220, %221 : vector<16x128xf32>
    %c288_181 = arith.constant 288 : index
    %c0_182 = arith.constant 0 : index
    %223 = vector.load %arg8[%c288_181, %c0_182] : memref<400x128xf32, #tpu.memory_space<vmem>>, vector<16x128xf32>
    tpu.vector_store %arg8[%c288_181, %c0_182], %222 {strides = array<i32>} : memref<400x128xf32, #tpu.memory_space<vmem>>, vector<16x128xf32>,
    %c118_i32_183 = arith.constant 118 : i32
    %224 = tpu.dynamic_rotate %148 by %c118_i32_183 dim 1 : vector<16x128xf32>, i32 -> vector<16x128xf32>
    %c304_184 = arith.constant 304 : index
    %c0_185 = arith.constant 0 : index
    %225 = vector.load %arg2[%c304_184, %c0_185] : memref<480x128xf32, #tpu.memory_space<vmem>>, vector<16x128xf32>
    %226 = arith.mulf %224, %225 : vector<16x128xf32>
    %c304_186 = arith.constant 304 : index
    %c0_187 = arith.constant 0 : index
    %227 = vector.load %arg8[%c304_186, %c0_187] : memref<400x128xf32, #tpu.memory_space<vmem>>, vector<16x128xf32>
    tpu.vector_store %arg8[%c304_186, %c0_187], %226 {strides = array<i32>} : memref<400x128xf32, #tpu.memory_space<vmem>>, vector<16x128xf32>,
    %c114_i32_188 = arith.constant 114 : i32
    %228 = tpu.dynamic_rotate %148 by %c114_i32_188 dim 1 : vector<16x128xf32>, i32 -> vector<16x128xf32>
    %c320_189 = arith.constant 320 : index
    %c0_190 = arith.constant 0 : index
    %229 = vector.load %arg2[%c320_189, %c0_190] : memref<480x128xf32, #tpu.memory_space<vmem>>, vector<16x128xf32>
    %230 = arith.mulf %228, %229 : vector<16x128xf32>
    %c320_191 = arith.constant 320 : index
    %c0_192 = arith.constant 0 : index
    %231 = vector.load %arg8[%c320_191, %c0_192] : memref<400x128xf32, #tpu.memory_space<vmem>>, vector<16x128xf32>
    tpu.vector_store %arg8[%c320_191, %c0_192], %230 {strides = array<i32>} : memref<400x128xf32, #tpu.memory_space<vmem>>, vector<16x128xf32>,
    %c113_i32_193 = arith.constant 113 : i32
    %232 = tpu.dynamic_rotate %148 by %c113_i32_193 dim 1 : vector<16x128xf32>, i32 -> vector<16x128xf32>
    %c336_194 = arith.constant 336 : index
    %c0_195 = arith.constant 0 : index
    %233 = vector.load %arg2[%c336_194, %c0_195] : memref<480x128xf32, #tpu.memory_space<vmem>>, vector<16x128xf32>
    %234 = arith.mulf %232, %233 : vector<16x128xf32>
    %c336_196 = arith.constant 336 : index
    %c0_197 = arith.constant 0 : index
    %235 = vector.load %arg8[%c336_196, %c0_197] : memref<400x128xf32, #tpu.memory_space<vmem>>, vector<16x128xf32>
    tpu.vector_store %arg8[%c336_196, %c0_197], %234 {strides = array<i32>} : memref<400x128xf32, #tpu.memory_space<vmem>>, vector<16x128xf32>,
    %c112_i32_198 = arith.constant 112 : i32
    %236 = tpu.dynamic_rotate %148 by %c112_i32_198 dim 1 : vector<16x128xf32>, i32 -> vector<16x128xf32>
    %c352_199 = arith.constant 352 : index
    %c0_200 = arith.constant 0 : index
    %237 = vector.load %arg2[%c352_199, %c0_200] : memref<480x128xf32, #tpu.memory_space<vmem>>, vector<16x128xf32>
    %238 = arith.mulf %236, %237 : vector<16x128xf32>
    %c352_201 = arith.constant 352 : index
    %c0_202 = arith.constant 0 : index
    %239 = vector.load %arg8[%c352_201, %c0_202] : memref<400x128xf32, #tpu.memory_space<vmem>>, vector<16x128xf32>
    tpu.vector_store %arg8[%c352_201, %c0_202], %238 {strides = array<i32>} : memref<400x128xf32, #tpu.memory_space<vmem>>, vector<16x128xf32>,
    %c111_i32_203 = arith.constant 111 : i32
    %240 = tpu.dynamic_rotate %148 by %c111_i32_203 dim 1 : vector<16x128xf32>, i32 -> vector<16x128xf32>
    %c368_204 = arith.constant 368 : index
    %c0_205 = arith.constant 0 : index
    %241 = vector.load %arg2[%c368_204, %c0_205] : memref<480x128xf32, #tpu.memory_space<vmem>>, vector<16x128xf32>
    %242 = arith.mulf %240, %241 : vector<16x128xf32>
    %c368_206 = arith.constant 368 : index
    %c0_207 = arith.constant 0 : index
    %243 = vector.load %arg8[%c368_206, %c0_207] : memref<400x128xf32, #tpu.memory_space<vmem>>, vector<16x128xf32>
    tpu.vector_store %arg8[%c368_206, %c0_207], %242 {strides = array<i32>} : memref<400x128xf32, #tpu.memory_space<vmem>>, vector<16x128xf32>,
    %c110_i32_208 = arith.constant 110 : i32
    %244 = tpu.dynamic_rotate %148 by %c110_i32_208 dim 1 : vector<16x128xf32>, i32 -> vector<16x128xf32>
    %c384_209 = arith.constant 384 : index
    %c0_210 = arith.constant 0 : index
    %245 = vector.load %arg2[%c384_209, %c0_210] : memref<480x128xf32, #tpu.memory_space<vmem>>, vector<16x128xf32>
    %246 = arith.mulf %244, %245 : vector<16x128xf32>
    %c384_211 = arith.constant 384 : index
    %c0_212 = arith.constant 0 : index
    %247 = vector.load %arg8[%c384_211, %c0_212] : memref<400x128xf32, #tpu.memory_space<vmem>>, vector<16x128xf32>
    tpu.vector_store %arg8[%c384_211, %c0_212], %246 {strides = array<i32>} : memref<400x128xf32, #tpu.memory_space<vmem>>, vector<16x128xf32>,
    %c448 = arith.constant 448 : index
    %c0_213 = arith.constant 0 : index
    %248 = vector.load %arg2[%c448, %c0_213] : memref<480x128xf32, #tpu.memory_space<vmem>>, vector<32x128xf32>
    %c0_214 = arith.constant 0 : index
    %c0_215 = arith.constant 0 : index
    %249 = vector.load %arg5[%c0_214, %c0_215] : memref<32x400xf32, #tpu.memory_space<vmem>>, vector<32x400xf32>
    %c0_216 = arith.constant 0 : index
    %c0_217 = arith.constant 0 : index
    %250 = vector.load %arg8[%c0_216, %c0_217] : memref<400x128xf32, #tpu.memory_space<vmem>>, vector<400x128xf32>
    %cst_218 = arith.constant dense<0.000000e+00> : vector<32x128xf32>
    %251 = tpu.matmul %249, %250, %cst_218 {dimension_numbers = #tpu.dot_dimension_numbers<[1], [0], [0], [1], [0, 0, 1, 1], [], []>} : vector<32x400xf32>, vector<400x128xf32>, vector<32x128xf32> -> vector<32x128xf32>
    %252 = arith.addf %251, %248 : vector<32x128xf32>
    %c424 = arith.constant 424 : index
    %c0_219 = arith.constant 0 : index
    %253 = vector.load %arg2[%c424, %c0_219] : memref<480x128xf32, #tpu.memory_space<vmem>>, vector<8x128xf32>
    %c432 = arith.constant 432 : index
    %c0_220 = arith.constant 0 : index
    %254 = vector.load %arg2[%c432, %c0_220] : memref<480x128xf32, #tpu.memory_space<vmem>>, vector<8x128xf32>
    %c440 = arith.constant 440 : index
    %c0_221 = arith.constant 0 : index
    %255 = vector.load %arg2[%c440, %c0_221] : memref<480x128xf32, #tpu.memory_space<vmem>>, vector<8x128xf32>
    %256 = vector.extract_strided_slice %252 {offsets = [0, 0], sizes = [8, 128], strides = [1, 1]} : vector<32x128xf32> to vector<8x128xf32>
    %257 = vector.extract_strided_slice %252 {offsets = [8, 0], sizes = [8, 128], strides = [1, 1]} : vector<32x128xf32> to vector<8x128xf32>
    %258 = vector.extract_strided_slice %252 {offsets = [16, 0], sizes = [8, 128], strides = [1, 1]} : vector<32x128xf32> to vector<8x128xf32>
    %259 = vector.extract_strided_slice %252 {offsets = [24, 0], sizes = [8, 128], strides = [1, 1]} : vector<32x128xf32> to vector<8x128xf32>
    %260 = arith.mulf %253, %147 : vector<8x128xf32>
    %261 = arith.addf %256, %260 : vector<8x128xf32>
    %262 = arith.negf %261 : vector<8x128xf32>
    %263 = math.exp %262 : vector<8x128xf32>
    %cst_222 = arith.constant 1.000000e+00 : f32
    %264 = vector.broadcast %cst_222 : f32 to vector<8x128xf32>
    %265 = arith.addf %264, %263 : vector<8x128xf32>
    %266 = arith.divf %264, %265 : vector<8x128xf32>
    %267 = arith.mulf %254, %147 : vector<8x128xf32>
    %268 = arith.addf %257, %267 : vector<8x128xf32>
    %269 = arith.negf %268 : vector<8x128xf32>
    %270 = math.exp %269 : vector<8x128xf32>
    %cst_223 = arith.constant 1.000000e+00 : f32
    %271 = vector.broadcast %cst_223 : f32 to vector<8x128xf32>
    %272 = arith.addf %271, %270 : vector<8x128xf32>
    %273 = arith.divf %271, %272 : vector<8x128xf32>
    %274 = math.tanh %258 : vector<8x128xf32>
    %275 = arith.mulf %273, %147 : vector<8x128xf32>
    %276 = arith.mulf %266, %274 : vector<8x128xf32>
    %277 = arith.addf %275, %276 : vector<8x128xf32>
    %278 = arith.mulf %255, %277 : vector<8x128xf32>
    %279 = arith.addf %259, %278 : vector<8x128xf32>
    %280 = arith.negf %279 : vector<8x128xf32>
    %281 = math.exp %280 : vector<8x128xf32>
    %cst_224 = arith.constant 1.000000e+00 : f32
    %282 = vector.broadcast %cst_224 : f32 to vector<8x128xf32>
    %283 = arith.addf %282, %281 : vector<8x128xf32>
    %284 = arith.divf %282, %283 : vector<8x128xf32>
    %285 = math.tanh %277 : vector<8x128xf32>
    %286 = arith.mulf %284, %285 : vector<8x128xf32>
    %c16_225 = arith.constant 16 : index
    %c0_226 = arith.constant 0 : index
    %287 = vector.load %arg7[%c16_225, %c0_226] : memref<32x128xf32, #tpu.memory_space<vmem>>, vector<8x128xf32>
    tpu.vector_store %arg7[%c16_225, %c0_226], %286 {strides = array<i32>} : memref<32x128xf32, #tpu.memory_space<vmem>>, vector<8x128xf32>,
    %c24_227 = arith.constant 24 : index
    %c0_228 = arith.constant 0 : index
    %288 = vector.load %arg7[%c24_227, %c0_228] : memref<32x128xf32, #tpu.memory_space<vmem>>, vector<8x128xf32>
    tpu.vector_store %arg7[%c24_227, %c0_228], %277 {strides = array<i32>} : memref<32x128xf32, #tpu.memory_space<vmem>>, vector<8x128xf32>,
    %c0_229 = arith.constant 0 : index
    %c0_230 = arith.constant 0 : index
    %c0_231 = arith.constant 0 : index
    %289 = vector.load %arg6[%c0_229, %c0_230, %c0_231] : memref<1x8x128xf32, #tpu.memory_space<vmem>>, vector<1x8x128xf32>
    %290 = vector.shape_cast %289 : vector<1x8x128xf32> to vector<8x128xf32>
    %291 = vector.shape_cast %286 : vector<8x128xf32> to vector<1x8x128xf32>
    tpu.vector_store %arg6[%c0_229, %c0_230, %c0_231], %291 {strides = array<i32>} : memref<1x8x128xf32, #tpu.memory_space<vmem>>, vector<1x8x128xf32>,
    return
  }
  func.func @transform_0(%arg0: i32) -> (i32, i32, i32) {
    %c0_i32 = arith.constant 0 : i32
    %c0_i32_0 = arith.constant 0 : i32
    %c0_i32_1 = arith.constant 0 : i32
    return %arg0, %c0_i32, %c0_i32_0 : i32, i32, i32
  }
  func.func @transform_1(%arg0: i32) -> (i32, i32) {
    %c0_i32 = arith.constant 0 : i32
    %c0_i32_0 = arith.constant 0 : i32
    %c0_i32_1 = arith.constant 0 : i32
    return %c0_i32, %c0_i32_0 : i32, i32
  }
  func.func @transform_2(%arg0: i32) -> (i32, i32) {
    %c0_i32 = arith.constant 0 : i32
    %c0_i32_0 = arith.constant 0 : i32
    %c0_i32_1 = arith.constant 0 : i32
    return %c0_i32, %c0_i32_0 : i32, i32
  }
  func.func @transform_3(%arg0: i32) -> (i32, i32) {
    %c0_i32 = arith.constant 0 : i32
    %c0_i32_0 = arith.constant 0 : i32
    %c0_i32_1 = arith.constant 0 : i32
    return %c0_i32, %c0_i32_0 : i32, i32
  }
  func.func @transform_4(%arg0: i32) -> (i32, i32) {
    %c0_i32 = arith.constant 0 : i32
    %c0_i32_0 = arith.constant 0 : i32
    %c0_i32_1 = arith.constant 0 : i32
    return %c0_i32, %c0_i32_0 : i32, i32
  }
  func.func @transform_5(%arg0: i32) -> (i32, i32, i32) {
    %c0_i32 = arith.constant 0 : i32
    %c0_i32_0 = arith.constant 0 : i32
    %c0_i32_1 = arith.constant 0 : i32
    return %arg0, %c0_i32, %c0_i32_0 : i32, i32, i32
  }
  func.func @transform_6(%arg0: i32) -> (i32, i32) {
    %c0_i32 = arith.constant 0 : i32
    %c0_i32_0 = arith.constant 0 : i32
    %c0_i32_1 = arith.constant 0 : i32
    return %c0_i32, %c0_i32_0 : i32, i32
  }
}

</mosaic_0001>

<bundles_post_ra>
// kernel: _run_seq.1
= control target key start
LH: loop header
LB: loop body
LE: loop exit
PB: predicated region body
PF: predicated region fallthrough
CT: control target
= control target key end

     0   :  { %12 = vsyncpa [#allocation4], 0  ;;  %s1518_s21 = smov 0   ;;  %s2120_s0 = inlined_call_operand.vmem [shape: f32[4,32,128], index: 0, kind: input, shape index: {}]   ;;  %s2121_s1 = inlined_call_operand.vmem [shape: f32[480,128], index: 1, kind: input, shape index: {}]   ;;  %s2122_s2 = inlined_call_operand.vmem [shape: f32[32,128], index: 2, kind: input, shape index: {}]   ;;  %s2123_s3 = inlined_call_operand.vmem [shape: f32[32,200], index: 3, kind: input, shape index: {}]   ;;  %s2124_s4 = inlined_call_operand.vmem [shape: f32[32,400], index: 4, kind: input, shape index: {}]   ;;  %s2125_s5 = inlined_call_operand.vmem [shape: f32[4,8,128], index: 5, kind: output, shape index: {0}]   ;;  %s2126_s6 = inlined_call_operand.hbm [shape: f32[32,128], index: 6, kind: output, shape index: {1}]  }
   0x1 LB: > { %s1524_s22 = sadd.s32 4294967295, %s1453_s21   ;;  %p1180_p0 = scmp.ge.s32.totalorder %s1453_s21, 1  ;;  %s1453_s21 = sphi %s1518_s21, %s18_s21  }
   0x2   : > { %p211_p1 = scmp.lt.s32.totalorder %s1453_s21, 5 }
   0x4   : > { %p212_p2 = pnand %p1180_p0, %p211_p1 }
   0x5   : > { %p240_p3 = scmp.lt.s32.totalorder (!%p212_p2), %s1524_s22, 3  ;;  %p1184_p4 = scmp.ne.s32.totalorder (!%p212_p2), %s1524_s22, 0 }
   0x6   : > { %215 = sbr.rel (%p212_p2) target bundleno = 989 (0x3dd), region = 40 }
   0xd   : > { %s241_s23 = scalar_select %p240_p3, %s1524_s22, 3 }
   0xe   : > { %252 = sbr.rel (%p1184_p4) target bundleno = 21 (0x15), region = 44  ;;  %v253_v0 = vld [vmem:[%s2122_s2] sm:$0xff] (!%p1184_p4)  ;;  %v254_v1 = vld [vmem:[%s2122_s2 + $0x8] sm:$0xff] (!%p1184_p4)  ;;  %v255_v2 = vld [vmem:[%s2122_s2 + $0x10] sm:$0xff] (!%p1184_p4) }
   0xf   : > { %s1203_s24 = sshll.u32 %s241_s23, 5  ;;  %s1183_s25 = sshll.u32 %s241_s23, 3  ;;  %257 = vst [vmem:[#allocation3] sm:$0xff] (!%p1184_p4), %v253_v0  ;;  %258 = vst [vmem:[#allocation3 + $0x8] sm:$0xff] (!%p1184_p4), %v254_v1  ;;  %v256_v3 = vld [vmem:[%s2122_s2 + $0x18] sm:$0xff] (!%p1184_p4) }
  0x10   : > { %s1533_s28 = scalar_lea.vmem %s2120_s0, %s1203_s24  ;;  %s1538_s7 = scalar_lea.vmem %s2125_s5, %s1183_s25  ;;  %259 = vst [vmem:[#allocation3 + $0x10] sm:$0xff] (!%p1184_p4), %v255_v2  ;;  %260 = vst [vmem:[#allocation3 + $0x18] sm:$0xff] (!%p1184_p4), %v256_v3 }
  0x15 PF: > { %s2156_s16 = smov 16   ;;  %s1456_s17 = smov 18   ;;  %v1457_v5 = vmov 0.0|0.0   ;;  %v391_v6 = vld [vmem:[%s2123_s3 + $0x8] sm:$0xff]  ;;  %vm423_vm0 = vcmask 588800   ;;  %v1611_v9 = vld [vmem:[%s2121_s1] sm:$0xff] }
  0x16   : > { %v1553_v4 = vld [vmem:[#allocation3] sm:$0xff]  ;;  %1248 = vmatprep.subr.bf16.mxu0 %v1457_v5  ;;  %s2154_s18 = smov 15   ;;  %s1459_s19 = smov 17   ;;  %1185 = vmatprep.mubr.msk.f32.mxu0 %vm423_vm0, %v391_v6  ;;  %v1616_v10 = vld [vmem:[%s2121_s1 + $0x10] sm:$0xff]  ;;  %vm878_vm1 = vcmask 130048  }
  0x17   : > { %273 = vrot.lane.b32.xlu1 %v1553_v4, %s2156_s16  ;;  %263 = vrot.lane.b32.xlu0 %v1553_v4, %s1456_s17  ;;  %s2151_s20 = smov 10   ;;  %s2153_s23 = smov 14   ;;  %v1621_v11 = vld [vmem:[%s2121_s1 + $0x20] sm:$0xff]  ;;  %v1626_v12 = vld [vmem:[%s2121_s1 + $0x30] sm:$0xff] }
  0x18   : > { %s2127_s24 = smov 8   ;;  %s2145_s25 = smov 9   ;;  %v1633_v17 = vld [vmem:[%s2121_s1 + $0x50] sm:$0xff]  ;;  %v1638_v18 = vld [vmem:[%s2121_s1 + $0x40] sm:$0xff] }
  0x19   : > { %s1464_s26 = smov 6   ;;  %s1465_s27 = smov 7   ;;  %v1648_v26 = vld [vmem:[%s2121_s1 + $0x70] sm:$0xff]  ;;  %v1653_v27 = vld [vmem:[%s2121_s1 + $0x60] sm:$0xff] }
  0x1a   : > { %s2155_s29 = smov 1   ;;  %s1467_s30 = smov 2   ;;  %v1661_v34 = vld [vmem:[%s2121_s1 + $0x90] sm:$0xff]  ;;  %v1666_v35 = vld [vmem:[%s2121_s1 + $0x80] sm:$0xff] }
  0x1b   : > { %278 = vrot.lane.b32.xlu1 %v1553_v4, %s2154_s18  ;;  %268 = vrot.lane.b32.xlu0 %v1553_v4, %s1459_s19  ;;  %s2152_s8 = smov 127   ;;  %s2149_s9 = smov 126   ;;  %v1674_v41 = vld [vmem:[%s2121_s1 + $0xb0] sm:$0xff]  ;;  %v1679_v42 = vld [vmem:[%s2121_s1 + $0xa0] sm:$0xff] }
  0x1c   : > { %s2133_s10 = smov 122   ;;  %s2129_s11 = smov 121   ;;  %v1687_v48 = vld [vmem:[%s2121_s1 + $0xc0] sm:$0xff]  ;;  %v1692_v49 = vld [vmem:[%s2121_s1 + $0xd0] sm:$0xff] }
  0x1d   : > { %s2131_s12 = smov 120   ;;  %s2141_s13 = smov 119   ;;  %v324_v53 = vmul.f32 %v1687_v48, %v1553_v4  ;;  %v1701_v55 = vld [vmem:[%s2121_s1 + $0xe0] sm:$0xff]  ;;  %v1706_v56 = vld [vmem:[%s2121_s1 + $0xf0] sm:$0xff] }
  0x1e   : > { %s2135_s14 = smov 118   ;;  %s2137_s15 = smov 114   ;;  %v1714_v62 = vld [vmem:[%s2121_s1 + $0x100] sm:$0xff]  ;;  %v1719_v63 = vld [vmem:[%s2121_s1 + $0x110] sm:$0xff] }
  0x1f   : > { %288 = vrot.lane.b32.xlu1 %v1553_v4, %s2151_s20  ;;  %283 = vrot.lane.b32.xlu0 %v1553_v4, %s2153_s23  ;;  %v1727_v6 = vld [vmem:[%s2121_s1 + $0x120] sm:$0xff]  ;;  %p1347_p5 = scmp.eq.s32.totalorder %s1524_s22, 3 }
  0x23   : > { %298 = vrot.lane.b32.xlu1 %v1553_v4, %s2127_s24  ;;  %293 = vrot.lane.b32.xlu0 %v1553_v4, %s2145_s25  ;;  %s2139_s24 = smov 113   ;;  %s2162_s25 = smov 120  }
  0x27   : > { %308 = vrot.lane.b32.xlu1 %v1553_v4, %s1464_s26  ;;  %303 = vrot.lane.b32.xlu0 %v1553_v4, %s1465_s27 }
  0x2b   : > { %318 = vrot.lane.b32.xlu1 %v1553_v4, %s2155_s29  ;;  %313 = vrot.lane.b32.xlu0 %v1553_v4, %s1467_s30 }
  0x2f   : > { %326 = vrot.lane.b32.xlu0 %v1553_v4, %s2152_s8  ;;  %331 = vrot.lane.b32.xlu1 %v1553_v4, %s2149_s9  ;;  %s2163_s9 = smov 119  }
  0x33   : > { %336 = vrot.lane.b32.xlu0 %v1553_v4, %s2133_s10  ;;  %341 = vrot.lane.b32.xlu1 %v1553_v4, %s2129_s11  ;;  %s2143_s11 = smov 112   ;;  %s2159_s10 = smov 122  }
  0x37   : > { %346 = vrot.lane.b32.xlu0 %v1553_v4, %s2131_s12  ;;  %351 = vrot.lane.b32.xlu1 %v1553_v4, %s2141_s13  ;;  %s2158_s13 = smov 9   ;;  %s2165_s12 = smov 114  }
  0x3b   : > { %356 = vrot.lane.b32.xlu0 %v1553_v4, %s2135_s14  ;;  %361 = vrot.lane.b32.xlu1 %v1553_v4, %s2137_s15  ;;  %s2147_s14 = smov 111   ;;  %s1479_s15 = smov 110  }
  0x3f   : > { %366 = vrot.lane.b32.xlu0 %v1553_v4, %s2139_s24  ;;  %371 = vrot.lane.b32.xlu1 %v1553_v4, %s2143_s11  ;;  %s2157_s24 = smov 126   ;;  %s2160_s11 = smov 8  }
  0x43   : > { %376 = vrot.lane.b32.xlu0 %v1553_v4, %s2147_s14  ;;  %381 = vrot.lane.b32.xlu1 %v1553_v4, %s1479_s15  ;;  %s2164_s14 = smov 118  }
  0x89   : > { %v274_v7 = vpop.permute.xlu1 %273  ;;  %v264_v8 = vpop.permute.xlu0 %263 }
  0x8a   : > { %v266_v15 = vmul.f32 %v1611_v9, %v264_v8  ;;  %v276_v19 = vmul.f32 %v1621_v11, %v274_v7  ;;  %v1732_v7 = vld [vmem:[%s2121_s1 + $0x130] sm:$0xff] }
  0x8d   : > { %v279_v13 = vpop.permute.xlu1 %278  ;;  %v269_v14 = vpop.permute.xlu0 %268 }
  0x8e   : > { %v271_v16 = vmul.f32 %v1616_v10, %v269_v14  ;;  %v281_v20 = vmul.f32 %v1626_v12, %v279_v13 }
  0x90   : > { %v1249_v21 = vpack.c.bf16 %v271_v16, %v266_v15  ;;  %v1252_v28 = vpack.c.bf16 %v281_v20, %v276_v19  ;;  %v1740_v19 = vld [vmem:[%s2121_s1 + $0x140] sm:$0xff]  ;;  %v1745_v20 = vld [vmem:[%s2121_s1 + $0x150] sm:$0xff] }
  0x91   : > { %v289_v22 = vpop.permute.xlu1 %288  ;;  %v284_v23 = vpop.permute.xlu0 %283 }
  0x92   : > { %1250 = vmatpush1.bf16.msra.mxu0 %v1249_v21  ;;  %v291_v24 = vmul.f32 %v1633_v17, %v289_v22  ;;  %v286_v25 = vmul.f32 %v1638_v18, %v284_v23 }
  0x93   : > { %1251 = vmatprep.subr.bf16.mxu0 %v1457_v5 }
  0x94   : > { %v1255_v31 = vpack.c.bf16 %v291_v24, %v286_v25  ;;  %v1753_v25 = vld [vmem:[%s2121_s1 + $0x160] sm:$0xff] }
  0x95   : > { %v299_v29 = vpop.permute.xlu1 %298  ;;  %v294_v30 = vpop.permute.xlu0 %293 }
  0x96   : > { %1253 = vmatpush1.bf16.msra.mxu0 %v1252_v28  ;;  %v301_v32 = vmul.f32 %v1648_v26, %v299_v29  ;;  %v296_v33 = vmul.f32 %v1653_v27, %v294_v30  ;;  %v1758_v29 = vld [vmem:[%s2121_s1 + $0x170] sm:$0xff] }
  0x97   : > { %1254 = vmatprep.subr.bf16.mxu0 %v1457_v5 }
  0x98   : > { %v1258_v38 = vpack.c.bf16 %v301_v32, %v296_v33 }
  0x99   : > { %v309_v36 = vpop.permute.xlu1 %308  ;;  %v304_v37 = vpop.permute.xlu0 %303 }
  0x9a   : > { %1256 = vmatpush1.bf16.msra.mxu0 %v1255_v31  ;;  %v311_v39 = vmul.f32 %v1661_v34, %v309_v36  ;;  %v306_v40 = vmul.f32 %v1666_v35, %v304_v37  ;;  %v1767_v37 = vld [vmem:[%s2121_s1 + $0x180] sm:$0xff] }
  0x9b   : > { %1257 = vmatprep.subr.bf16.mxu0 %v1457_v5 }
  0x9c   : > { %v1261_v45 = vpack.c.bf16 %v311_v39, %v306_v40  ;;  %v1480_v40 = vmov 0.0  }
  0x9d   : > { %v319_v43 = vpop.permute.xlu1 %318  ;;  %v314_v44 = vpop.permute.xlu0 %313 }
  0x9e   : > { %1259 = vmatpush1.bf16.msra.mxu0 %v1258_v38  ;;  %v321_v46 = vmul.f32 %v1674_v41, %v319_v43  ;;  %v316_v47 = vmul.f32 %v1679_v42, %v314_v44  ;;  %v390_v43 = vld [vmem:[%s2123_s3] sm:$0xff]  ;;  %v393_v44 = vld [vmem:[%s2123_s3 + $0x18] sm:$0xff] }
  0x9f   : > { %1260 = vmatprep.subr.bf16.mxu0 %v1457_v5 }
  0xa0   : > { %v1264_v52 = vpack.c.bf16 %v321_v46, %v316_v47  ;;  %v395_v46 = vld [vmem:[%s2123_s3 + $0x28] sm:$0xff]  ;;  %v394_v47 = vld [vmem:[%s2123_s3 + $0x20] sm:$0xff] }
  0xa1   : > { %v327_v50 = vpop.permute.xlu0 %326  ;;  %v332_v51 = vpop.permute.xlu1 %331 }
  0xa2   : > { %1262 = vmatpush1.bf16.msra.mxu0 %v1261_v45  ;;  %v329_v54 = vmul.f32 %v1692_v49, %v327_v50  ;;  %v334_v60 = vmul.f32 %v1701_v55, %v332_v51  ;;  %v392_v45 = vld [vmem:[%s2123_s3 + $0x10] sm:$0xff]  ;;  %v397_v50 = vld [vmem:[%s2123_s3 + $0x38] sm:$0xff] }
  0xa3   : > { %1263 = vmatprep.subr.bf16.mxu0 %v1457_v5  ;;  %v396_v51 = vld [vmem:[%s2123_s3 + $0x30] sm:$0xff] }
  0xa4   : > { %v1267_v59 = vpack.c.bf16 %v329_v54, %v324_v53  ;;  %v262_v53 = vld [vmem:[#allocation3 + $0x8] sm:$0xff]  ;;  %v525_v54 = vld [vmem:[%s2121_s1 + $0x190] sm:$0xff] }
  0xa5   : > { %v337_v57 = vpop.permute.xlu0 %336  ;;  %v342_v58 = vpop.permute.xlu1 %341 }
  0xa6   : > { %1265 = vmatpush1.bf16.msra.mxu0 %v1264_v52  ;;  %v339_v61 = vmul.f32 %v1706_v56, %v337_v57  ;;  %v344_v3 = vmul.f32 %v1714_v62, %v342_v58  ;;  %v1794_v52 = vld [vmem:[#allocation3 + $0x10] sm:$0xff]  ;;  %v386_v57 = vld [vmem:[%s1533_s28] sm:$0xff]  ;;  %v528_v58 = vmul.f32 %v525_v54, %v262_v53 }
  0xa7   : > { %1266 = vmatprep.subr.bf16.mxu0 %v1457_v5  ;;  %644 = vrot.lane.b32.xlu1 %v1794_v52, %s1465_s27 }
  0xa8   : > { %v1270_v2 = vpack.c.bf16 %v339_v61, %v334_v60  ;;  %v526_v60 = vld [vmem:[%s2121_s1 + $0x198] sm:$0xff] }
  0xa9   : > { %v347_v0 = vpop.permute.xlu0 %346  ;;  %v352_v1 = vpop.permute.xlu1 %351 }
  0xaa   : > { %1268 = vmatpush1.bf16.msra.mxu0 %v1267_v59  ;;  %v349_v4 = vmul.f32 %v1719_v63, %v347_v0  ;;  %v354_v15 = vmul.f32 %v1727_v6, %v352_v1  ;;  %v387_v1 = vld [vmem:[%s1533_s28 + $0x8] sm:$0xff] }
  0xab   : > { %1269 = vmatprep.subr.bf16.mxu0 %v1457_v5  ;;  %564 = vrot.lane.b32.xlu1 %v1794_v52, %s1456_s17 }
  0xac   : > { %v1273_v14 = vpack.c.bf16 %v349_v4, %v344_v3  ;;  %v536_v3 = vmul.f32 %v526_v60, %v262_v53 }
  0xad   : > { %v357_v8 = vpop.permute.xlu0 %356  ;;  %v362_v13 = vpop.permute.xlu1 %361 }
  0xae   : > { %1271 = vmatpush1.bf16.msra.mxu0 %v1270_v2  ;;  %v359_v16 = vmul.f32 %v1732_v7, %v357_v8  ;;  %v364_v23 = vmul.f32 %v1740_v19, %v362_v13 }
  0xaf   : > { %1272 = vmatprep.subr.bf16.mxu0 %v1457_v5  ;;  %654 = vrot.lane.b32.xlu1 %v1794_v52, %s1464_s26 }
  0xb0   : > { %v1276_v22 = vpack.c.bf16 %v359_v16, %v354_v15 }
  0xb1   : > { %v367_v21 = vpop.permute.xlu0 %366  ;;  %v372_v28 = vpop.permute.xlu1 %371 }
  0xb2   : > { %1274 = vmatpush1.bf16.msra.mxu0 %v1273_v14  ;;  %v369_v24 = vmul.f32 %v1745_v20, %v367_v21  ;;  %v374_v32 = vmul.f32 %v1753_v25, %v372_v28 }
  0xb3   : > { %1275 = vmatprep.subr.bf16.mxu0 %v1457_v5  ;;  %574 = vrot.lane.b32.xlu1 %v1794_v52, %s1459_s19 }
  0xb4   : > { %v1279_v31 = vpack.c.bf16 %v369_v24, %v364_v23  ;;  %v388_v23 = vld [vmem:[%s1533_s28 + $0x10] sm:$0xff] }
  0xb5   : > { %v377_v30 = vpop.permute.xlu0 %376  ;;  %v382_v38 = vpop.permute.xlu1 %381 }
  0xb6   : > { %1277 = vmatpush1.bf16.msra.mxu0 %v1276_v22  ;;  %v379_v33 = vmul.f32 %v1758_v29, %v377_v30  ;;  %v384_v39 = vmul.f32 %v1767_v37, %v382_v38 }
  0xb7   : > { %1278 = vmatprep.subr.bf16.mxu0 %v1457_v5  ;;  %664 = vrot.lane.b32.xlu1 %v1794_v52, %s1467_s30 }
  0xb8   : > { %v1282_v36 = vpack.c.bf16 %v379_v33, %v374_v32 }
  0xba   : > { %1280 = vmatpush1.bf16.msra.mxu0 %v1279_v31 }
  0xbb   : > { %1281 = vmatprep.subr.bf16.mxu0 %v1457_v5  ;;  %584 = vrot.lane.b32.xlu1 %v1794_v52, %s2156_s16  ;;  %s2170_s16 = smov 1  }
  0xbe   : > { %1283 = vmatpush1.bf16.msra.mxu0 %v1282_v36 }
  0xbf   : > { %484 = vmatprep.subr.mxu0 %v1480_v40  ;;  %674 = vrot.lane.b32.xlu1 %v1794_v52, %s2155_s29  ;;  %s2171_s29 = smov 15  }
  0xc2   : > { %485 = vmatpush1.msra.mxu0 %v384_v39 }
  0xc3   : > { %501 = vmatmul.mubr.f32.vlgmr.msra.gmra.mrb[0].mxu0 %v390_v43  ;;  %594 = vrot.lane.b32.xlu1 %v1794_v52, %s2154_s18  ;;  %s2168_s18 = smov 111  }
  0xc4   : > { %1186 = vmatprep.mubr.msk.f32.mxu0 %vm423_vm0, %v393_v44  ;;  %v389_v44 = vld [vmem:[%s1533_s28 + $0x18] sm:$0xff]  ;;  %s2169_s28 = smov 16  }
  0xc7   : > { %506 = vmatmul.mubr.f32.gmra.mrb[2].mxu0 %v392_v45  ;;  %604 = vrot.lane.b32.xlu1 %v1794_v52, %s2153_s23  ;;  %s2167_s23 = smov 112  }
  0xc8   : > { %1187 = vmatprep.mubr.msk.f32.mxu0 %vm423_vm0, %v395_v46  ;;  %v527_v46 = vld [vmem:[%s2121_s1 + $0x1a0] sm:$0xff] }
  0xcb   : > { %511 = vmatmul.mubr.f32.gmra.mrb[4].mxu0 %v394_v47  ;;  %690 = vrot.lane.b32.xlu1 %v1794_v52, %s2152_s8  ;;  %s2166_s8 = smov 113  }
  0xcc   : > { %1188 = vmatprep.mubr.msk.f32.mxu0 %vm423_vm0, %v397_v50 }
  0xcf   : > { %516 = vmatmul.mubr.f32.gmra.mrb[6].mxu0 %v396_v51  ;;  %614 = vrot.lane.b32.xlu1 %v1794_v52, %s2151_s20  ;;  %s2161_s20 = smov 121  }
  0xd3   : > { %700 = vrot.lane.b32.xlu1 %v1794_v52, %s2157_s24 }
  0xd7   : > { %624 = vrot.lane.b32.xlu1 %v1794_v52, %s2158_s13 }
  0xdb   : > { %710 = vrot.lane.b32.xlu1 %v1794_v52, %s2159_s10 }
  0xdf   : > { %634 = vrot.lane.b32.xlu1 %v1794_v52, %s2160_s11 }
  0xe3   : > { %720 = vrot.lane.b32.xlu1 %v1794_v52, %s2161_s20 }
  0xe7   : > { %730 = vrot.lane.b32.xlu1 %v1794_v52, %s2162_s25 }
  0xeb   : > { %740 = vrot.lane.b32.xlu1 %v1794_v52, %s2163_s9 }
  0xef   : > { %750 = vrot.lane.b32.xlu1 %v1794_v52, %s2164_s14 }
  0xf3   : > { %760 = vrot.lane.b32.xlu1 %v1794_v52, %s2165_s12 }
  0xf7   : > { %770 = vrot.lane.b32.xlu1 %v1794_v52, %s2166_s8 }
  0xfb   : > { %780 = vrot.lane.b32.xlu1 %v1794_v52, %s2167_s23 }
  0xff   : > { %790 = vrot.lane.b32.xlu1 %v1794_v52, %s2168_s18 }
 0x103   : > { %800 = vrot.lane.b32.xlu1 %v1794_v52, %s1479_s15 }
 0x196   : > { %v502_v59 = vpop.f32.mrb[0].mxu0 }
 0x197   : > { %v521_v61 = vadd.f32 %v502_v59, %v386_v57  ;;  %v504_v0 = vpop.f32.mrb[1].mxu0 }
 0x198   : > { %v813_v0 = vld [vmem:[%s2124_s4 + $0x8] sm:$0xff] }
 0x199   : > { %v529_v2 = vadd.f32 %v528_v58, %v521_v61  ;;  %955 = vmatprep.mubr.f32.mxu1 %v813_v0 }
 0x19a   : > { %v507_v4 = vpop.f32.mrb[2].mxu0 }
 0x19b   : > { %v1189_v8 = vmul.f32 -1.442695, %v529_v2  ;;  %v522_v13 = vadd.f32 %v507_v4, %v387_v1  ;;  %v509_v14 = vpop.f32.mrb[3].mxu0  ;;  %v645_v1 = vpop.permute.xlu1 %644 }
 0x19d   : > { %1385 = vpow2.f32 %v1189_v8  ;;  %v537_v15 = vadd.f32 %v536_v3, %v522_v13 }
 0x19e   : > { %v512_v16 = vpop.f32.mrb[4].mxu0 }
 0x19f   : > { %v1190_v21 = vmul.f32 -1.442695, %v537_v15  ;;  %v514_v22 = vpop.f32.mrb[5].mxu0  ;;  %v523_v30 = vadd.f32 %v512_v16, %v388_v23  ;;  %v565_v2 = vpop.permute.xlu1 %564  ;;  %v647_v16 = vld [vmem:[%s2121_s1 + $0x88] sm:$0xff] }
 0x1a0   : > { %v649_v22 = vmul.f32 %v647_v16, %v645_v1 }
 0x1a1   : > { %1387 = vpow2.f32 %v1190_v21 }
 0x1a2   : > { %v517_v24 = vpop.f32.mrb[6].mxu0  ;;  %1389 = vtanh.f32 %v523_v30 }
 0x1a3   : > { %v519_v28 = vpop.f32.mrb[7].mxu0  ;;  %v524_v47 = vadd.f32 %v517_v24, %v389_v44  ;;  %v655_v3 = vpop.permute.xlu1 %654  ;;  %v567_v24 = vld [vmem:[%s2121_s1 + $0x8] sm:$0xff]  ;;  %v577_v44 = vld [vmem:[%s2121_s1 + $0x18] sm:$0xff] }
 0x1a4   : > { %v569_v30 = vmul.f32 %v567_v24, %v565_v2  ;;  %v677_v2 = vld [vmem:[%s2121_s1 + $0xb8] sm:$0xff] }
 0x1a7   : > { %v1386_v31 = vpop.eup %1385  ;;  %v575_v4 = vpop.permute.xlu1 %574 }
 0x1a8   : > { %v533_v32 = vadd.f32 1.0, %v1386_v31 }
 0x1aa   : > { %1391 = vrcp.f32 %v533_v32 }
 0x1ab   : > { %v1388_v33 = vpop.eup %1387  ;;  %v665_v8 = vpop.permute.xlu1 %664 }
 0x1ac   : > { %v541_v36 = vadd.f32 1.0, %v1388_v33  ;;  %v1390_v38 = vpop.eup %1389  ;;  %v657_v33 = vld [vmem:[%s2121_s1 + $0x98] sm:$0xff] }
 0x1ae   : > { %1393 = vrcp.f32 %v541_v36 }
 0x1af   : > { %v585_v13 = vpop.permute.xlu1 %584 }
 0x1b3   : > { %v675_v14 = vpop.permute.xlu1 %674 }
 0x1b4   : > { %v1392_v39 = vpop.eup %1391 }
 0x1b5   : > { %v546_v40 = vmul.f32 %v1392_v39, %v1390_v38  ;;  %v659_v39 = vmul.f32 %v657_v33, %v655_v3 }
 0x1b7   : > { %v595_v15 = vpop.permute.xlu1 %594 }
 0x1b8   : > { %v1394_v43 = vpop.eup %1393 }
 0x1b9   : > { %v545_v45 = vmul.f32 %v1394_v43, %v262_v53 }
 0x1bb   : > { %v547_v50 = vadd.f32 %v546_v40, %v545_v45  ;;  %v605_v21 = vpop.permute.xlu1 %604 }
 0x1bd   : > { %v548_v51 = vmul.f32 %v547_v50, %v527_v46  ;;  %559 = vst [vmem:[#allocation3 + $0x8] sm:$0xff] %v547_v50 }
 0x1bf   : > { %v549_v54 = vadd.f32 %v548_v51, %v524_v47  ;;  %v691_v36 = vpop.permute.xlu1 %690  ;;  %v579_v47 = vmul.f32 %v577_v44, %v575_v4  ;;  %v667_v51 = vld [vmem:[%s2121_s1 + $0xa8] sm:$0xff] }
 0x1c1   : > { %v1191_v57 = vmul.f32 -1.442695, %v549_v54 }
 0x1c3   : > { %1395 = vpow2.f32 %v1191_v57  ;;  %v615_v45 = vpop.permute.xlu1 %614  ;;  %v669_v57 = vmul.f32 %v667_v51, %v665_v8  ;;  %v679_v8 = vmul.f32 %v677_v2, %v675_v14 }
 0x1c4   : > { %1397 = vtanh.f32 %v547_v50 }
 0x1cd   : > { %v1396_v58 = vpop.eup %1395 }
 0x1ce   : > { %v553_v59 = vadd.f32 1.0, %v1396_v58  ;;  %v1398_v60 = vpop.eup %1397 }
 0x1d0   : > { %1399 = vrcp.f32 %v553_v59  ;;  %v587_v59 = vld [vmem:[%s2121_s1 + $0x28] sm:$0xff] }
 0x1d1   : > { %v589_v0 = vmul.f32 %v587_v59, %v585_v13  ;;  %v683_v13 = vld [vmem:[%s2121_s1 + $0xc8] sm:$0xff] }
 0x1da   : > { %v1400_v53 = vpop.eup %1399 }
 0x1db   : > { %v1857_v61 = vmul.f32 %v1400_v53, %v1398_v60 }
 0x1dd   : > { %558 = vst [vmem:[#allocation3] sm:$0xff] %v1857_v61  ;;  %642 = vrot.lane.b32.xlu0 %v1857_v61, %s1465_s27  ;;  %s2172_s27 = smov 14   ;;  %v684_v14 = vmul.f32 %v1857_v61, %v1687_v48 }
 0x1e1   : > { %562 = vrot.lane.b32.xlu0 %v1857_v61, %s1456_s17  ;;  %s2173_s17 = smov 127  }
 0x1e5   : > { %652 = vrot.lane.b32.xlu0 %v1857_v61, %s1464_s26  ;;  %s2174_s26 = smov 10  }
 0x1e9   : > { %572 = vrot.lane.b32.xlu0 %v1857_v61, %s1459_s19 }
 0x1ed   : > { %662 = vrot.lane.b32.xlu0 %v1857_v61, %s1467_s30 }
 0x1f1   : > { %582 = vrot.lane.b32.xlu0 %v1857_v61, %s2169_s28 }
 0x1f5   : > { %672 = vrot.lane.b32.xlu0 %v1857_v61, %s2170_s16 }
 0x1f9   : > { %592 = vrot.lane.b32.xlu0 %v1857_v61, %s2171_s29  ;;  %s1481_s29 = smov [#allocation3]  }
 0x1fd   : > { %602 = vrot.lane.b32.xlu0 %v1857_v61, %s2172_s27  ;;  %s1110_s27 = sshll.u32 %s1481_s29, 4  ;;  %s1111_s27 = int_to_ptr.vmem [resolvable:$true] %s1110_s27 }
 0x1fe   : > { %p1424_p9 = scmp.lt.s32.totalorder %s1111_s27, %s1111_s27 }
 0x201   : > { %688 = vrot.lane.b32.xlu0 %v1857_v61, %s2173_s17  ;;  %s1417_s17 = scalar_lea.vmem %s1111_s27, 512 }
 0x202   : > { %p1418_p6 = scmp.ne.s32.totalorder %s1111_s27, %s1417_s17  ;;  %p1425_p10 = scmp.lt.s32.totalorder %s1417_s17, %s1417_s17 }
 0x204   : > { %p1419_p7 = pnand %p1418_p6, %p1347_p5  ;;  %p1426_p11 = por %p1425_p10, %p1424_p9 }
 0x205   : > { %612 = vrot.lane.b32.xlu0 %v1857_v61, %s2174_s26 }
 0x206   : > { %p1420_p8 = pneg %p1419_p7 }
 0x208   : > { %p1427_p12 = pnand %p1426_p11, %p1420_p8 }
 0x209   : > { %698 = vrot.lane.b32.xlu0 %v1857_v61, %s2157_s24 }
 0x20d   : > { %622 = vrot.lane.b32.xlu0 %v1857_v61, %s2158_s13 }
 0x211   : > { %708 = vrot.lane.b32.xlu0 %v1857_v61, %s2159_s10 }
 0x215   : > { %632 = vrot.lane.b32.xlu0 %v1857_v61, %s2160_s11 }
 0x219   : > { %718 = vrot.lane.b32.xlu0 %v1857_v61, %s2161_s20 }
 0x21d   : > { %728 = vrot.lane.b32.xlu0 %v1857_v61, %s2162_s25 }
 0x221   : > { %738 = vrot.lane.b32.xlu0 %v1857_v61, %s2163_s9 }
 0x225   : > { %748 = vrot.lane.b32.xlu0 %v1857_v61, %s2164_s14 }
 0x229   : > { %758 = vrot.lane.b32.xlu0 %v1857_v61, %s2165_s12 }
 0x22d   : > { %768 = vrot.lane.b32.xlu0 %v1857_v61, %s2166_s8 }
 0x231   : > { %778 = vrot.lane.b32.xlu0 %v1857_v61, %s2167_s23 }
 0x235   : > { %788 = vrot.lane.b32.xlu0 %v1857_v61, %s2168_s18 }
 0x239   : > { %798 = vrot.lane.b32.xlu0 %v1857_v61, %s1479_s15 }
 0x24f   : > { %v643_v23 = vpop.permute.xlu0 %642 }
 0x250   : > { %v648_v28 = vmul.f32 %v643_v23, %v1666_v35 }
 0x252   : > { %v1284_v31 = vpack.c.bf16 %v649_v22, %v648_v28  ;;  %v597_v22 = vld [vmem:[%s2121_s1 + $0x38] sm:$0xff] }
 0x253   : > { %v563_v32 = vpop.permute.xlu0 %562  ;;  %v599_v24 = vmul.f32 %v597_v22, %v595_v15  ;;  %v693_v15 = vld [vmem:[%s2121_s1 + $0xd8] sm:$0xff] }
 0x254   : > { %v568_v38 = vmul.f32 %v563_v32, %v1611_v9  ;;  %1285 = vmatprep.subr.bf16.mxu1 %v1284_v31  ;;  %v695_v61 = vmul.f32 %v693_v15, %v691_v36  ;;  %v753_v15 = vld [vmem:[%s2121_s1 + $0x138] sm:$0xff] }
 0x256   : > { %v1286_v40 = vpack.c.bf16 %v569_v30, %v568_v38  ;;  %v685_v30 = vmul.f32 %v683_v13, %v1794_v52 }
 0x257   : > { %v653_v43 = vpop.permute.xlu0 %652 }
 0x258   : > { %v658_v35 = vmul.f32 %v653_v43, %v1661_v34  ;;  %1287 = vmatpush3.bf16.msra.mxu1 %v1286_v40  ;;  %v701_v34 = vpop.permute.xlu1 %700 }
 0x25a   : > { %v1288_v46 = vpack.c.bf16 %v659_v39, %v658_v35  ;;  %v1300_v39 = vpack.c.bf16 %v685_v30, %v684_v14  ;;  %v743_v30 = vld [vmem:[%s2121_s1 + $0x128] sm:$0xff] }
 0x25b   : > { %v573_v50 = vpop.permute.xlu0 %572 }
 0x25c   : > { %v578_v9 = vmul.f32 %v573_v50, %v1616_v10  ;;  %1289 = vmatprep.subr.bf16.mxu1 %v1288_v46  ;;  %v625_v3 = vpop.permute.xlu1 %624 }
 0x25e   : > { %v1290_v54 = vpack.c.bf16 %v579_v47, %v578_v9 }
 0x25f   : > { %v663_v58 = vpop.permute.xlu0 %662 }
 0x260   : > { %v668_v60 = vmul.f32 %v663_v58, %v1679_v42  ;;  %1291 = vmatpush3.bf16.msra.mxu1 %v1290_v54  ;;  %v711_v31 = vpop.permute.xlu1 %710  ;;  %v627_v54 = vld [vmem:[%s2121_s1 + $0x68] sm:$0xff] }
 0x261   : > { %v629_v58 = vmul.f32 %v627_v54, %v625_v3 }
 0x262   : > { %v1292_v53 = vpack.c.bf16 %v669_v57, %v668_v60  ;;  %v713_v60 = vld [vmem:[%s2121_s1 + $0xf8] sm:$0xff] }
 0x263   : > { %v583_v1 = vpop.permute.xlu0 %582 }
 0x264   : > { %v588_v10 = vmul.f32 %v583_v1, %v1621_v11  ;;  %1293 = vmatprep.subr.bf16.mxu1 %v1292_v53  ;;  %v607_v11 = vld [vmem:[%s2121_s1 + $0x48] sm:$0xff]  ;;  %v635_v43 = vpop.permute.xlu1 %634  ;;  %v715_v53 = vmul.f32 %v713_v60, %v711_v31  ;;  %v637_v1 = vld [vmem:[%s2121_s1 + $0x78] sm:$0xff] }
 0x265   : > { %v609_v33 = vmul.f32 %v607_v11, %v605_v21  ;;  %v639_v3 = vmul.f32 %v637_v1, %v635_v43  ;;  %v793_v60 = vld [vmem:[%s2121_s1 + $0x178] sm:$0xff] }
 0x266   : > { %v1294_v4 = vpack.c.bf16 %v589_v0, %v588_v10 }
 0x267   : > { %v673_v16 = vpop.permute.xlu0 %672 }
 0x268   : > { %v678_v42 = vmul.f32 %v673_v16, %v1674_v41  ;;  %1295 = vmatpush3.bf16.msra.mxu1 %v1294_v4  ;;  %v721_v47 = vpop.permute.xlu1 %720 }
 0x26a   : > { %v1296_v23 = vpack.c.bf16 %v679_v8, %v678_v42  ;;  %v723_v8 = vld [vmem:[%s2121_s1 + $0x108] sm:$0xff] }
 0x26b   : > { %v593_v28 = vpop.permute.xlu0 %592  ;;  %v725_v42 = vmul.f32 %v723_v8, %v721_v47  ;;  %v814_v8 = vld [vmem:[%s2124_s4 + $0x10] sm:$0xff] }
 0x26c   : > { %v598_v41 = vmul.f32 %v593_v28, %v1626_v12  ;;  %1297 = vmatprep.subr.bf16.mxu1 %v1296_v23  ;;  %v617_v12 = vld [vmem:[%s2121_s1 + $0x58] sm:$0xff] }
 0x26d   : > { %v619_v35 = vmul.f32 %v617_v12, %v615_v45  ;;  %v731_v45 = vpop.permute.xlu1 %730  ;;  %v733_v23 = vld [vmem:[%s2121_s1 + $0x118] sm:$0xff] }
 0x26e   : > { %v1298_v32 = vpack.c.bf16 %v599_v24, %v598_v41  ;;  %v812_v24 = vld [vmem:[%s2124_s4] sm:$0xff]  ;;  %v735_v11 = vmul.f32 %v733_v23, %v731_v45 }
 0x26f   : > { %v603_v38 = vpop.permute.xlu0 %602  ;;  %v816_v41 = vld [vmem:[%s2124_s4 + $0x20] sm:$0xff] }
 0x270   : > { %v608_v40 = vmul.f32 %v603_v38, %v1638_v18  ;;  %1299 = vmatpush3.bf16.msra.mxu1 %v1298_v32  ;;  %v703_v18 = vld [vmem:[%s2121_s1 + $0xe8] sm:$0xff] }
 0x271   : > { %1301 = vmatprep.subr.bf16.mxu1 %v1300_v39  ;;  %v705_v51 = vmul.f32 %v703_v18, %v701_v34  ;;  %v821_v32 = vld [vmem:[%s2124_s4 + $0x48] sm:$0xff] }
 0x272   : > { %v1302_v48 = vpack.c.bf16 %v609_v33, %v608_v40  ;;  %v820_v40 = vld [vmem:[%s2124_s4 + $0x40] sm:$0xff] }
 0x273   : > { %v689_v52 = vpop.permute.xlu0 %688 }
 0x274   : > { %v694_v21 = vmul.f32 %v689_v52, %v1692_v49  ;;  %1303 = vmatpush3.bf16.msra.mxu1 %v1302_v48  ;;  %v825_v48 = vld [vmem:[%s2124_s4 + $0x68] sm:$0xff] }
 0x276   : > { %v1304_v44 = vpack.c.bf16 %v695_v61, %v694_v21 }
 0x277   : > { %v613_v46 = vpop.permute.xlu0 %612 }
 0x278   : > { %v618_v50 = vmul.f32 %v613_v46, %v1633_v17  ;;  %1305 = vmatprep.subr.bf16.mxu1 %v1304_v44  ;;  %v824_v44 = vld [vmem:[%s2124_s4 + $0x60] sm:$0xff] }
 0x27a   : > { %v1306_v36 = vpack.c.bf16 %v619_v35, %v618_v50  ;;  %v815_v35 = vld [vmem:[%s2124_s4 + $0x18] sm:$0xff] }
 0x27b   : > { %v699_v9 = vpop.permute.xlu0 %698 }
 0x27c   : > { %v704_v49 = vmul.f32 %v699_v9, %v1701_v55  ;;  %1307 = vmatpush3.bf16.msra.mxu1 %v1306_v36  ;;  %v741_v55 = vpop.permute.xlu1 %740 }
 0x27d   : > { %v745_v38 = vmul.f32 %v743_v30, %v741_v55 }
 0x27e   : > { %v1308_v57 = vpack.c.bf16 %v705_v51, %v704_v49  ;;  %v783_v49 = vld [vmem:[%s2121_s1 + $0x168] sm:$0xff] }
 0x27f   : > { %v623_v59 = vpop.permute.xlu0 %622 }
 0x280   : > { %v628_v17 = vmul.f32 %v623_v59, %v1653_v27  ;;  %1309 = vmatprep.subr.bf16.mxu1 %v1308_v57  ;;  %v751_v16 = vpop.permute.xlu1 %750 }
 0x281   : > { %v755_v52 = vmul.f32 %v753_v15, %v751_v16  ;;  %v827_v16 = vld [vmem:[%s2124_s4 + $0x78] sm:$0xff] }
 0x282   : > { %v1310_v34 = vpack.c.bf16 %v629_v58, %v628_v17 }
 0x283   : > { %v709_v0 = vpop.permute.xlu0 %708 }
 0x284   : > { %v714_v2 = vmul.f32 %v709_v0, %v1706_v56  ;;  %1311 = vmatpush3.bf16.msra.mxu1 %v1310_v34 }
 0x286   : > { %v1312_v10 = vpack.c.bf16 %v715_v53, %v714_v2 }
 0x287   : > { %v633_v4 = vpop.permute.xlu0 %632 }
 0x288   : > { %v638_v27 = vmul.f32 %v633_v4, %v1648_v26  ;;  %1313 = vmatprep.subr.bf16.mxu1 %v1312_v10  ;;  %v817_v26 = vld [vmem:[%s2124_s4 + $0x28] sm:$0xff] }
 0x28a   : > { %v1314_v22 = vpack.c.bf16 %v639_v3, %v638_v27  ;;  %v822_v27 = vld [vmem:[%s2124_s4 + $0x50] sm:$0xff] }
 0x28b   : > { %v719_v13 = vpop.permute.xlu0 %718 }
 0x28c   : > { %v724_v56 = vmul.f32 %v719_v13, %v1714_v62  ;;  %1315 = vmatpush3.bf16.msra.mxu1 %v1314_v22  ;;  %v761_v62 = vpop.permute.xlu1 %760  ;;  %v826_v22 = vld [vmem:[%s2124_s4 + $0x70] sm:$0xff] }
 0x28d   : > { %1316 = vmatprep.subr.bf16.mxu1 %v1457_v5 }
 0x28e   : > { %v1317_v28 = vpack.c.bf16 %v725_v42, %v724_v56 }
 0x28f   : > { %v729_v14 = vpop.permute.xlu0 %728  ;;  %956 = vmatmul.mubr.f32.vlgmr.msra.gmra.mrb[0].mxu1 %v812_v24 }
 0x290   : > { %v734_v31 = vmul.f32 %v729_v14, %v1719_v63  ;;  %1318 = vmatpush1.bf16.msra.mxu1 %v1317_v28  ;;  %960 = vmatprep.mubr.f32.mxu1 %v817_v26  ;;  %v771_v43 = vpop.permute.xlu1 %770 }
 0x291   : > { %1319 = vmatprep.subr.bf16.mxu1 %v1457_v5 }
 0x292   : > { %v1320_v33 = vpack.c.bf16 %v735_v11, %v734_v31 }
 0x293   : > { %v739_v39 = vpop.permute.xlu0 %738  ;;  %961 = vmatmul.mubr.f32.gmra.mrb[2].mxu1 %v816_v41  ;;  %v561_v41 = vld [vmem:[#allocation3 + $0x18] sm:$0xff] }
 0x294   : > { %v744_v63 = vmul.f32 %v739_v39, %v1727_v6  ;;  %1321 = vmatpush1.bf16.msra.mxu1 %v1320_v33  ;;  %965 = vmatprep.mubr.f32.mxu1 %v821_v32  ;;  %v763_v6 = vld [vmem:[%s2121_s1 + $0x148] sm:$0xff]  ;;  %v781_v50 = vpop.permute.xlu1 %780  ;;  %v808_v32 = vld [vmem:[%s2121_s1 + $0x1c0] sm:$0xff] }
 0x295   : > { %1322 = vmatprep.subr.bf16.mxu1 %v1457_v5  ;;  %v765_v18 = vmul.f32 %v763_v6, %v761_v62  ;;  %v1061_v33 = vld [vmem:[%s2121_s1 + $0x1a8] sm:$0xff] }
 0x296   : > { %v1323_v61 = vpack.c.bf16 %v745_v38, %v744_v63  ;;  %v1064_v39 = vmul.f32 %v1061_v33, %v561_v41  ;;  %v809_v63 = vld [vmem:[%s2121_s1 + $0x1c8] sm:$0xff] }
 0x297   : > { %v749_v12 = vpop.permute.xlu0 %748  ;;  %966 = vmatmul.mubr.f32.gmra.mrb[4].mxu1 %v820_v40  ;;  %v1062_v40 = vld [vmem:[%s2121_s1 + $0x1b0] sm:$0xff] }
 0x298   : > { %v754_v21 = vmul.f32 %v749_v12, %v1732_v7  ;;  %1324 = vmatpush1.bf16.msra.mxu1 %v1323_v61  ;;  %970 = vmatprep.mubr.f32.mxu1 %v825_v48  ;;  %v773_v7 = vld [vmem:[%s2121_s1 + $0x158] sm:$0xff]  ;;  %v791_v57 = vpop.permute.xlu1 %790  ;;  %v1072_v12 = vmul.f32 %v1062_v40, %v561_v41 }
 0x299   : > { %1325 = vmatprep.subr.bf16.mxu1 %v1457_v5  ;;  %v775_v9 = vmul.f32 %v773_v7, %v771_v43  ;;  %v795_v53 = vmul.f32 %v793_v60, %v791_v57 }
 0x29a   : > { %v1326_v46 = vpack.c.bf16 %v755_v52, %v754_v21  ;;  %v810_v21 = vld [vmem:[%s2121_s1 + $0x1d0] sm:$0xff] }
 0x29b   : > { %v759_v47 = vpop.permute.xlu0 %758  ;;  %971 = vmatmul.mubr.f32.gmra.mrb[6].mxu1 %v824_v44 }
 0x29c   : > { %v764_v36 = vmul.f32 %v759_v47, %v1740_v19  ;;  %1327 = vmatpush1.bf16.msra.mxu1 %v1326_v46  ;;  %1192 = vmatprep.mubr.msk.f32.mxu1 %vm878_vm1, %v815_v35  ;;  %v785_v19 = vmul.f32 %v783_v49, %v781_v50  ;;  %v801_v1 = vpop.permute.xlu1 %800  ;;  %v811_v50 = vld [vmem:[%s2121_s1 + $0x1d8] sm:$0xff] }
 0x29d   : > { %1328 = vmatprep.subr.bf16.mxu1 %v1457_v5 }
 0x29e   : > { %v1329_v51 = vpack.c.bf16 %v765_v18, %v764_v36 }
 0x29f   : > { %v769_v54 = vpop.permute.xlu0 %768 }
 0x2a0   : > { %v774_v45 = vmul.f32 %v769_v54, %v1745_v20  ;;  %1330 = vmatpush1.bf16.msra.mxu1 %v1329_v51  ;;  %v803_v20 = vld [vmem:[%s2121_s1 + $0x188] sm:$0xff] }
 0x2a1   : > { %1331 = vmatprep.subr.bf16.mxu1 %v1457_v5  ;;  %v805_v10 = vmul.f32 %v803_v20, %v801_v1  ;;  %v1063_v1 = vld [vmem:[%s2121_s1 + $0x1b8] sm:$0xff] }
 0x2a2   : > { %v1332_v58 = vpack.c.bf16 %v775_v9, %v774_v45 }
 0x2a3   : > { %v779_v59 = vpop.permute.xlu0 %778 }
 0x2a4   : > { %v784_v17 = vmul.f32 %v779_v59, %v1753_v25  ;;  %1333 = vmatpush1.bf16.msra.mxu1 %v1332_v58 }
 0x2a5   : > { %1334 = vmatprep.subr.bf16.mxu1 %v1457_v5 }
 0x2a6   : > { %v1335_v34 = vpack.c.bf16 %v785_v19, %v784_v17 }
 0x2a7   : > { %v789_v0 = vpop.permute.xlu0 %788 }
 0x2a8   : > { %v794_v55 = vmul.f32 %v789_v0, %v1758_v29  ;;  %1336 = vmatpush1.bf16.msra.mxu1 %v1335_v34  ;;  %v819_v29 = vld [vmem:[%s2124_s4 + $0x38] sm:$0xff] }
 0x2a9   : > { %1337 = vmatprep.subr.bf16.mxu1 %v1457_v5 }
 0x2aa   : > { %v1338_v2 = vpack.c.bf16 %v795_v53, %v794_v55 }
 0x2ab   : > { %v799_v3 = vpop.permute.xlu0 %798 }
 0x2ac   : > { %v804_v25 = vmul.f32 %v799_v3, %v1767_v37  ;;  %1339 = vmatpush1.bf16.msra.mxu1 %v1338_v2  ;;  %v818_v37 = vld [vmem:[%s2124_s4 + $0x30] sm:$0xff] }
 0x2ad   : > { %1340 = vmatprep.subr.bf16.mxu1 %v1457_v5  ;;  %v823_v5 = vld [vmem:[%s2124_s4 + $0x58] sm:$0xff] }
 0x2ae   : > { %v1341_v4 = vpack.c.bf16 %v805_v10, %v804_v25 }
 0x2b0   : > { %1342 = vmatpush1.bf16.msra.mxu1 %v1341_v4 }
 0x2b3   : > { %1041 = vmatmul.mubr.f32.vlgmr.msra.gmra.mrb[8].mxu1 %v814_v8 }
 0x2b4   : > { %1193 = vmatprep.mubr.msk.f32.mxu1 %vm878_vm1, %v819_v29 }
 0x2b7   : > { %1046 = vmatmul.mubr.f32.gmra.mrb[10].mxu1 %v818_v37 }
 0x2b8   : > { %1194 = vmatprep.mubr.msk.f32.mxu1 %vm878_vm1, %v823_v5 }
 0x2bb   : > { %1051 = vmatmul.mubr.f32.gmra.mrb[12].mxu1 %v822_v27 }
 0x2bc   : > { %1195 = vmatprep.mubr.msk.f32.mxu1 %vm878_vm1, %v827_v16 }
 0x2bf   : > { %1056 = vmatmul.mubr.f32.gmra.mrb[14].mxu1 %v826_v22 }
 0x362   : > { %v1236_v42 = vpop.f32.mrb[0].mxu1 }
 0x363   : > { %v1237_v13 = vpop.f32.mrb[1].mxu1 }
 0x364   : > { %v1238_v23 = vadd.f32 %v1237_v13, %v1236_v42 }
 0x366   : > { %v1239_v56 = vpop.f32.mrb[2].mxu1  ;;  %v958_v38 = vadd.f32 %v1238_v23, %v808_v32 }
 0x367   : > { %v1240_v24 = vpop.f32.mrb[3].mxu1 }
 0x368   : > { %v1241_v26 = vadd.f32 %v1240_v24, %v1239_v56 }
 0x36a   : > { %v1242_v28 = vpop.f32.mrb[4].mxu1  ;;  %v963_v52 = vadd.f32 %v1241_v26, %v809_v63 }
 0x36b   : > { %v1243_v11 = vpop.f32.mrb[5].mxu1 }
 0x36c   : > { %v1244_v14 = vadd.f32 %v1243_v11, %v1242_v28 }
 0x36e   : > { %v1245_v30 = vpop.f32.mrb[6].mxu1  ;;  %v968_v47 = vadd.f32 %v1244_v14, %v810_v21 }
 0x36f   : > { %v1246_v62 = vpop.f32.mrb[7].mxu1 }
 0x370   : > { %v1247_v31 = vadd.f32 %v1246_v62, %v1245_v30 }
 0x372   : > { %v973_v54 = vadd.f32 %v1247_v31, %v811_v50 }
 0x386   : > { %v1042_v15 = vpop.f32.mrb[8].mxu1 }
 0x387   : > { %v1043_v43 = vadd.f32 %v1042_v15, %v958_v38  ;;  %v1044_v48 = vpop.f32.mrb[9].mxu1 }
 0x389   : > { %v1065_v61 = vadd.f32 %v1064_v39, %v1043_v43 }
 0x38a   : > { %v1047_v6 = vpop.f32.mrb[10].mxu1 }
 0x38b   : > { %v1196_v44 = vmul.f32 -1.442695, %v1065_v61  ;;  %v1048_v35 = vadd.f32 %v1047_v6, %v963_v52  ;;  %v1049_v46 = vpop.f32.mrb[11].mxu1 }
 0x38d   : > { %1401 = vpow2.f32 %v1196_v44  ;;  %v1073_v18 = vadd.f32 %v1072_v12, %v1048_v35 }
 0x38e   : > { %v1052_v7 = vpop.f32.mrb[12].mxu1 }
 0x38f   : > { %v1197_v36 = vmul.f32 -1.442695, %v1073_v18  ;;  %v1053_v51 = vadd.f32 %v1052_v7, %v968_v47  ;;  %v1054_v9 = vpop.f32.mrb[13].mxu1 }
 0x391   : > { %1403 = vpow2.f32 %v1197_v36 }
 0x392   : > { %v1057_v49 = vpop.f32.mrb[14].mxu1  ;;  %1405 = vtanh.f32 %v1053_v51 }
 0x393   : > { %v1058_v45 = vadd.f32 %v1057_v49, %v973_v54  ;;  %v1059_v57 = vpop.f32.mrb[15].mxu1 }
 0x397   : > { %v1402_v58 = vpop.eup %1401 }
 0x398   : > { %v1069_v19 = vadd.f32 1.0, %v1402_v58 }
 0x39a   : > { %1407 = vrcp.f32 %v1069_v19 }
 0x39b   : > { %v1404_v59 = vpop.eup %1403 }
 0x39c   : > { %v1077_v60 = vadd.f32 1.0, %v1404_v59  ;;  %v1406_v17 = vpop.eup %1405 }
 0x39e   : > { %1409 = vrcp.f32 %v1077_v60 }
 0x3a4   : > { %v1408_v34 = vpop.eup %1407 }
 0x3a5   : > { %v1082_v53 = vmul.f32 %v1408_v34, %v1406_v17 }
 0x3a8   : > { %v1410_v0 = vpop.eup %1409 }
 0x3a9   : > { %v1081_v20 = vmul.f32 %v1410_v0, %v561_v41 }
 0x3ab   : > { %v1083_v55 = vadd.f32 %v1082_v53, %v1081_v20 }
 0x3ad   : > { %v1084_v2 = vmul.f32 %v1083_v55, %v1063_v1  ;;  %1095 = vst [vmem:[#allocation3 + $0x18] sm:$0xff] %v1083_v55 }
 0x3af   : > { %v1085_v10 = vadd.f32 %v1084_v2, %v1058_v45 }
 0x3b1   : > { %v1198_v3 = vmul.f32 -1.442695, %v1085_v10 }
 0x3b3   : > { %1411 = vpow2.f32 %v1198_v3 }
 0x3b4   : > { %1413 = vtanh.f32 %v1083_v55 }
 0x3bd   : > { %v1412_v25 = vpop.eup %1411 }
 0x3be   : > { %v1089_v4 = vadd.f32 1.0, %v1412_v25  ;;  %v1414_v8 = vpop.eup %1413 }
 0x3c0   : > { %1415 = vrcp.f32 %v1089_v4 }
 0x3ca   : > { %v1416_v29 = vpop.eup %1415 }
 0x3cb   : > { %v1093_v37 = vmul.f32 %v1416_v29, %v1414_v8 }
 0x3cd   : > { %1094 = vst [vmem:[#allocation3 + $0x10] sm:$0xff] %v1093_v37  ;;  %1096 = vst [vmem:[%s1538_s7] sm:$0xff] %v1093_v37 }
 0x3ce   : > { %1430 = shalt.err (!%p1427_p12)
}
 0x3cf   : > { %s1431_s30 = scalar_lea.hbm %s2126_s6, 512 }
 0x3d0   : > { %p1432_p13 = scmp.ne.s32.totalorder %s2126_s6, %s1431_s30  ;;  %p1437_p2 = scmp.lt.u32.totalorder %s1431_s30, %s2126_s6 }
 0x3d2   : > { %p1433_p0 = pnand %p1432_p13, %p1347_p5 }
 0x3d4   : > { %p1434_p1 = pneg %p1433_p0 }
 0x3d6   : > { %p1439_p3 = pnand %p1437_p2, %p1434_p1 }
 0x3d8   : > { %1442 = shalt.err (!%p1439_p3)
}
 0x3d9   : > { %s1482_s13 = smov 128  }
 0x3da   : > { %1344 = dma.vmem_to_hbm [thread:$0]  (%p1347_p5), %s1111_s27, 512, %s2126_s6, [#allocation4], %s1482_s13, %s1482_s13, %s2160_s11  }
 0x3db   : > { %1448 = dma.done.wait (%p1347_p5), [#allocation4], 512  }
 0x3dc   : > { %1450 = vsyncadd (%p1347_p5), [#allocation4], 4294966784 }
 0x3dd PF: > { %s18_s21 = sadd.s32 1, %s1453_s21  }
 0x3de   : > { %p15_p4 = scmp.ge.s32.totalorder %s18_s21, 6  }
 0x3e0   :  { %17 = sbr.rel (!%p15_p4) target bundleno = 1 (0x1), region = 83 }
 0x3e7   :  { %1133 = vsyncpa [#allocation4], 1 }
 0x3e8   :  { %1135 = vsyncpa [#allocation4 + $0x1], 1 }

</bundles_post_ra>
